<compile_context>
chip_gen: v7x
topology: tpu7x:2x2x1
jax: 0.10.0
libtpu: 0.0.40
codegen_flags: <defaults>
</compile_context>

<pallas_src>
import functools
import numpy as np
import jax
import jax.numpy as jnp
from jax import lax
from jax.experimental import pallas as pl
from jax.experimental.pallas import tpu as pltpu

LN_EPS = 1e-6
F32 = jnp.float32
BF16 = jnp.bfloat16


# ----------------------------- in-kernel helpers ----------------------------

def _layernorm(x, g, b, eps=LN_EPS):
    mean = jnp.mean(x, axis=-1, keepdims=True)
    xc = x - mean
    var = jnp.mean(xc * xc, axis=-1, keepdims=True)
    return xc * lax.rsqrt(var + eps) * g + b


def _softmax_rows(s):
    m = jnp.max(s, axis=-1, keepdims=True)
    p = jnp.exp(s - m)
    denom = jnp.sum(p, axis=-1, keepdims=True)
    return p * pl.reciprocal(denom, approx=True)


def _mh_attention(q, k, v, wo, *, B, Lq, Lk, H, dk, dv):
    """Head-batched attention + output projection.

    q:(B*Lq,H*dk) f32, k:(B*Lk,H*dk) f32, v:(B*Lk,H*dv) f32, wo:(H,dv,D) bf16
    -> (B*Lq, D) f32.  Heads are moved onto a leading (major) batch axis so the
    score / PV contractions are single batched dot_generals over B*H.
    1/sqrt(d_k) is already folded into Wq.
    """
    qh = jnp.concatenate(
        [q[:, h * dk:(h + 1) * dk].reshape(B, Lq, dk) for h in range(H)], axis=0)
    kh = jnp.concatenate(
        [k[:, h * dk:(h + 1) * dk].reshape(B, Lk, dk) for h in range(H)], axis=0)
    vh = jnp.concatenate(
        [v[:, h * dv:(h + 1) * dv].reshape(B, Lk, dv) for h in range(H)], axis=0)
    s = lax.dot_general(qh.astype(BF16), kh.astype(BF16),
                        (((2,), (2,)), ((0,), (0,))),
                        preferred_element_type=F32)            # (H*B, Lq, Lk)
    p = _softmax_rows(s)
    o = lax.dot_general(p.astype(BF16), vh.astype(BF16),
                        (((2,), (1,)), ((0,), (0,))),
                        preferred_element_type=F32)            # (H*B, Lq, dv)
    o = o.reshape(H, B * Lq, dv)
    # attn @ Wo == sum_h attn_h @ Wo_h  (head-batched projection + reduce)
    proj = lax.dot_general(o.astype(BF16), wo,
                           (((2,), (1,)), ((0,), (0,))),
                           preferred_element_type=F32)         # (H, B*Lq, D)
    return jnp.sum(proj, axis=0)


# ------------------------------- fused kernels ------------------------------

def _encoder_stack_kernel(ids_ref, emb_ref, pos_ref, ln0_ref,
                          wqkv_ref, wo_ref, w1_ref, w2_ref, vec_ref,
                          x_ref, *, B, L, V, H, dk, dv, D, Dff):
    M = B * L
    hdk = H * dk

    @pl.when(pl.program_id(0) == 0)
    def _():
        # embedding lookup (one-hot matmul), positional add, stack LayerNorm
        col = lax.broadcasted_iota(jnp.int32, (M, V), 1)
        onehot = (ids_ref[...] == col).astype(BF16)
        e = jnp.dot(onehot, emb_ref[...], preferred_element_type=F32)
        e = e + jnp.concatenate([pos_ref[...]] * B, axis=0)
        x_ref[...] = _layernorm(e, ln0_ref[0:1, :], ln0_ref[1:2, :])

    x = x_ref[...]
    vec = vec_ref[0]

    # --- self-attention sublayer ---
    qkv = jnp.dot(x.astype(BF16), wqkv_ref[0], preferred_element_type=F32)
    attn = _mh_attention(qkv[:, :hdk], qkv[:, hdk:2 * hdk], qkv[:, 2 * hdk:],
                         wo_ref[0], B=B, Lq=L, Lk=L, H=H, dk=dk, dv=dv)
    y = _layernorm(attn + x, vec[0:1, :D], vec[1:2, :D])

    # --- position-wise FFN sublayer ---
    h = jnp.dot(y.astype(BF16), w1_ref[0], preferred_element_type=F32) + vec[2:3, :Dff]
    h = jnp.maximum(h, 0.0)
    z = jnp.dot(h.astype(BF16), w2_ref[0], preferred_element_type=F32) + vec[3:4, :D] + y
    x_ref[...] = _layernorm(z, vec[4:5, :D], vec[5:6, :D])


def _decoder_stack_kernel(ids_ref, emb_ref, pos_ref, ln0_ref, enc_ref,
                          wqkv_s_ref, wo_s_ref, wqkv_c_ref, wo_c_ref,
                          w1_ref, w2_ref, vec_ref, proj_ref,
                          logits_ref, x_scr,
                          *, B, Lq, Lk, V, H, dk, dv, D, Dff):
    M = B * Lq
    hdk = H * dk

    @pl.when(pl.program_id(0) == 0)
    def _():
        col = lax.broadcasted_iota(jnp.int32, (M, V), 1)
        onehot = (ids_ref[...] == col).astype(BF16)
        e = jnp.dot(onehot, emb_ref[...], preferred_element_type=F32)
        e = e + jnp.concatenate([pos_ref[...]] * B, axis=0)
        x_scr[...] = _layernorm(e, ln0_ref[0:1, :], ln0_ref[1:2, :])

    x = x_scr[...]
    vec = vec_ref[0]

    # --- self-attention (un-masked: trg_mask never reaches DecoderLayer) ---
    qkv = jnp.dot(x.astype(BF16), wqkv_s_ref[0], preferred_element_type=F32)
    attn = _mh_attention(qkv[:, :hdk], qkv[:, hdk:2 * hdk], qkv[:, 2 * hdk:],
                         wo_s_ref[0], B=B, Lq=Lq, Lk=Lq, H=H, dk=dk, dv=dv)
    x = _layernorm(attn + x, vec[0:1, :D], vec[1:2, :D])

    # --- encoder-decoder cross attention ---
    wqkv_c = wqkv_c_ref[0]
    q = jnp.dot(x.astype(BF16), wqkv_c[:, :hdk], preferred_element_type=F32)
    kv = jnp.dot(enc_ref[...].astype(BF16), wqkv_c[:, hdk:],
                 preferred_element_type=F32)
    attn = _mh_attention(q, kv[:, :hdk], kv[:, hdk:], wo_c_ref[0],
                         B=B, Lq=Lq, Lk=Lk, H=H, dk=dk, dv=dv)
    x = _layernorm(attn + x, vec[2:3, :D], vec[3:4, :D])

    # --- position-wise FFN ---
    h = jnp.dot(x.astype(BF16), w1_ref[0], preferred_element_type=F32) + vec[4:5, :Dff]
    h = jnp.maximum(h, 0.0)
    z = jnp.dot(h.astype(BF16), w2_ref[0], preferred_element_type=F32) + vec[5:6, :D] + x
    x = _layernorm(z, vec[6:7, :D], vec[7:8, :D])
    x_scr[...] = x

    # --- final vocabulary projection folded into the last layer step ---
    @pl.when(pl.program_id(0) == pl.num_programs(0) - 1)
    def _():
        logits_ref[...] = jnp.dot(x.astype(BF16), proj_ref[...],
                                  preferred_element_type=F32)


# ------------------------------ kernel wrappers -----------------------------

def encoder_forward(p, src_ids, cfg):
    B, L = src_ids.shape
    D, Dff = cfg["d_model"], cfg["d_inner"]
    H, dk, dv = cfg["n_head"], cfg["d_k"], cfg["d_v"]
    V, nl = cfg["n_src_vocab"], cfg["n_layers"]
    M = B * L
    Dmax = p["vec"].shape[-1]
    kern = functools.partial(_encoder_stack_kernel, B=B, L=L, V=V, H=H,
                             dk=dk, dv=dv, D=D, Dff=Dff)
    return pl.pallas_call(
        kern,
        out_shape=jax.ShapeDtypeStruct((M, D), F32),
        grid=(nl,),
        in_specs=[
            pl.BlockSpec((M, 1), lambda l: (0, 0)),
            pl.BlockSpec((V, D), lambda l: (0, 0)),
            pl.BlockSpec((L, D), lambda l: (0, 0)),
            pl.BlockSpec((2, D), lambda l: (0, 0)),
            pl.BlockSpec((1, D, 2 * H * dk + H * dv), lambda l: (l, 0, 0)),
            pl.BlockSpec((1, H, dv, D), lambda l: (l, 0, 0, 0)),
            pl.BlockSpec((1, D, Dff), lambda l: (l, 0, 0)),
            pl.BlockSpec((1, Dff, D), lambda l: (l, 0, 0)),
            pl.BlockSpec((1, 6, Dmax), lambda l: (l, 0, 0)),
        ],
        out_specs=pl.BlockSpec((M, D), lambda l: (0, 0)),
        compiler_params=pltpu.CompilerParams(dimension_semantics=("arbitrary",)),
    )(src_ids.reshape(M, 1), p["emb"], p["pos_table"][:L], p["ln0"],
      p["wqkv"], p["wo"], p["w1"], p["w2"], p["vec"])


def decoder_forward(p, proj_w, trg_ids, enc_out, cfg):
    B, L = trg_ids.shape
    D, Dff = cfg["d_model"], cfg["d_inner"]
    H, dk, dv = cfg["n_head"], cfg["d_k"], cfg["d_v"]
    V, nl = cfg["n_trg_vocab"], cfg["n_layers"]
    M = B * L
    Lk = enc_out.shape[0] // B
    Dmax = p["vec"].shape[-1]
    kern = functools.partial(_decoder_stack_kernel, B=B, Lq=L, Lk=Lk, V=V,
                             H=H, dk=dk, dv=dv, D=D, Dff=Dff)
    return pl.pallas_call(
        kern,
        out_shape=jax.ShapeDtypeStruct((M, V), F32),
        grid=(nl,),
        in_specs=[
            pl.BlockSpec((M, 1), lambda l: (0, 0)),
            pl.BlockSpec((V, D), lambda l: (0, 0)),
            pl.BlockSpec((L, D), lambda l: (0, 0)),
            pl.BlockSpec((2, D), lambda l: (0, 0)),
            pl.BlockSpec((B * Lk, D), lambda l: (0, 0)),
            pl.BlockSpec((1, D, 2 * H * dk + H * dv), lambda l: (l, 0, 0)),
            pl.BlockSpec((1, H, dv, D), lambda l: (l, 0, 0, 0)),
            pl.BlockSpec((1, D, 2 * H * dk + H * dv), lambda l: (l, 0, 0)),
            pl.BlockSpec((1, H, dv, D), lambda l: (l, 0, 0, 0)),
            pl.BlockSpec((1, D, Dff), lambda l: (l, 0, 0)),
            pl.BlockSpec((1, Dff, D), lambda l: (l, 0, 0)),
            pl.BlockSpec((1, 8, Dmax), lambda l: (l, 0, 0)),
            pl.BlockSpec((D, V), lambda l: (0, 0)),
        ],
        out_specs=pl.BlockSpec((M, V), lambda l: (0, 0)),
        scratch_shapes=[pltpu.VMEM((M, D), F32)],
        compiler_params=pltpu.CompilerParams(dimension_semantics=("arbitrary",)),
    )(trg_ids.reshape(M, 1), p["emb"], p["pos_table"][:L], p["ln0"], enc_out,
      p["wqkv_s"], p["wo_s"], p["wqkv_c"], p["wo_c"],
      p["w1"], p["w2"], p["vec"], proj_w)


# ----------------------------- parameter init ------------------------------

def xavier_uniform(key, shape):
    fan_in, fan_out = shape
    bound = float(np.sqrt(6.0 / (fan_in + fan_out)))
    return jax.random.uniform(key, shape, F32, -bound, bound)


def uniform_bias(key, n, fan_in):
    b = 1.0 / float(np.sqrt(fan_in))
    return jax.random.uniform(key, (n,), F32, -b, b)


def sinusoid_table(n_position, d_hid):
    pos = np.arange(n_position)[:, None].astype(np.float64)
    j = np.arange(d_hid)[None, :]
    angle = pos / np.power(10000.0, 2 * (j // 2) / d_hid)
    tbl = np.zeros((n_position, d_hid), dtype=np.float32)
    tbl[:, 0::2] = np.sin(angle[:, 0::2])
    tbl[:, 1::2] = np.cos(angle[:, 1::2])
    return jnp.asarray(tbl)


def init_mha(key, d_model, n_head, d_k, d_v):
    ks = jax.random.split(key, 4)
    wq = xavier_uniform(ks[0], (d_model, n_head * d_k))
    wk = xavier_uniform(ks[1], (d_model, n_head * d_k))
    wv = xavier_uniform(ks[2], (d_model, n_head * d_v))
    wo = xavier_uniform(ks[3], (n_head * d_v, d_model))
    scale = 1.0 / float(np.sqrt(d_k))                 # fold 1/sqrt(d_k) into Wq
    return dict(wqkv=jnp.concatenate([wq * scale, wk, wv], axis=1), wo=wo,
                ln_g=jnp.ones((d_model,), F32), ln_b=jnp.zeros((d_model,), F32))


def init_ffn(key, d_model, d_inner):
    k1, k2, k3, k4 = jax.random.split(key, 4)
    return dict(w1=xavier_uniform(k1, (d_model, d_inner)),
                b1=uniform_bias(k2, d_inner, d_model),
                w2=xavier_uniform(k3, (d_inner, d_model)),
                b2=uniform_bias(k4, d_model, d_inner),
                ln_g=jnp.ones((d_model,), F32), ln_b=jnp.zeros((d_model,), F32))


def init_transformer(key, cfg):
    d_model, d_inner = cfg["d_model"], cfg["d_inner"]
    n_head, d_k, d_v = cfg["n_head"], cfg["d_k"], cfg["d_v"]
    n_layers = cfg["n_layers"]
    keys = jax.random.split(key, 8)

    def init_enc_layer(k):
        k1, k2 = jax.random.split(k, 2)
        return dict(slf=init_mha(k1, d_model, n_head, d_k, d_v),
                    ffn=init_ffn(k2, d_model, d_inner))

    def init_dec_layer(k):
        k1, k2, k3 = jax.random.split(k, 3)
        return dict(slf=init_mha(k1, d_model, n_head, d_k, d_v),
                    crs=init_mha(k2, d_model, n_head, d_k, d_v),
                    ffn=init_ffn(k3, d_model, d_inner))

    enc_keys = jax.random.split(keys[0], n_layers)
    dec_keys = jax.random.split(keys[1], n_layers)
    return dict(
        encoder=dict(
            emb=xavier_uniform(keys[2], (cfg["n_src_vocab"], cfg["d_word_vec"])),
            pos_table=sinusoid_table(cfg["n_position"], cfg["d_word_vec"]),
            ln_g=jnp.ones((d_model,), F32), ln_b=jnp.zeros((d_model,), F32),
            layers=[init_enc_layer(k) for k in enc_keys]),
        decoder=dict(
            emb=xavier_uniform(keys[3], (cfg["n_trg_vocab"], cfg["d_word_vec"])),
            pos_table=sinusoid_table(cfg["n_position"], cfg["d_word_vec"]),
            ln_g=jnp.ones((d_model,), F32), ln_b=jnp.zeros((d_model,), F32),
            layers=[init_dec_layer(k) for k in dec_keys]),
        trg_word_prj=xavier_uniform(keys[4], (d_model, cfg["n_trg_vocab"])),
    )


def prepare_params(params, cfg):
    """Stack per-layer weights along a leading layer axis, cast matmul weights
    to bf16, and pack small per-layer vectors into one padded 2-D array."""
    D, Dff = cfg["d_model"], cfg["d_inner"]
    H, dv = cfg["n_head"], cfg["d_v"]
    Dmax = max(D, Dff)

    def pad(v):
        return jnp.pad(v, (0, Dmax - v.shape[0]))

    def stack_wo(layers, key):
        return jnp.stack([l[key]["wo"].reshape(H, dv, D) for l in layers]).astype(BF16)

    enc, dec = params["encoder"], params["decoder"]
    el, dl = enc["layers"], dec["layers"]

    enc_prep = dict(
        emb=enc["emb"].astype(BF16),
        pos_table=enc["pos_table"],
        ln0=jnp.stack([enc["ln_g"], enc["ln_b"]]),
        wqkv=jnp.stack([l["slf"]["wqkv"] for l in el]).astype(BF16),
        wo=stack_wo(el, "slf"),
        w1=jnp.stack([l["ffn"]["w1"] for l in el]).astype(BF16),
        w2=jnp.stack([l["ffn"]["w2"] for l in el]).astype(BF16),
        vec=jnp.stack([jnp.stack([pad(l["slf"]["ln_g"]), pad(l["slf"]["ln_b"]),
                                  pad(l["ffn"]["b1"]), pad(l["ffn"]["b2"]),
                                  pad(l["ffn"]["ln_g"]), pad(l["ffn"]["ln_b"])])
                       for l in el]),
    )
    dec_prep = dict(
        emb=dec["emb"].astype(BF16),
        pos_table=dec["pos_table"],
        ln0=jnp.stack([dec["ln_g"], dec["ln_b"]]),
        wqkv_s=jnp.stack([l["slf"]["wqkv"] for l in dl]).astype(BF16),
        wo_s=stack_wo(dl, "slf"),
        wqkv_c=jnp.stack([l["crs"]["wqkv"] for l in dl]).astype(BF16),
        wo_c=stack_wo(dl, "crs"),
        w1=jnp.stack([l["ffn"]["w1"] for l in dl]).astype(BF16),
        w2=jnp.stack([l["ffn"]["w2"] for l in dl]).astype(BF16),
        vec=jnp.stack([jnp.stack([pad(l["slf"]["ln_g"]), pad(l["slf"]["ln_b"]),
                                  pad(l["crs"]["ln_g"]), pad(l["crs"]["ln_b"]),
                                  pad(l["ffn"]["b1"]), pad(l["ffn"]["b2"]),
                                  pad(l["ffn"]["ln_g"]), pad(l["ffn"]["ln_b"])])
                       for l in dl]),
    )
    return dict(encoder=enc_prep, decoder=dec_prep,
                trg_word_prj=params["trg_word_prj"].astype(BF16))


# ------------------------------ model forward ------------------------------

def get_subsequent_mask(seq):
    # Defined for parity with the reference; its result never reaches any
    # DecoderLayer (the reference calls dec_layer(dec_output, enc_output)),
    # so it is not evaluated in this forward.
    len_s = seq.shape[1]
    return (1 - jnp.triu(jnp.ones((1, len_s, len_s), F32), k=1)).astype(bool)


def transformer_forward(prep, input_data, cfg):
    # InputLayer: identity; .squeeze(-1)
    x = jnp.squeeze(input_data, axis=-1)                    # (B, L+1) float ids
    src_seq = x[:, :-1].astype(jnp.int32)                   # .long()
    trg_seq = x[:, 1:].astype(jnp.int32)
    B, L = trg_seq.shape
    enc_out = encoder_forward(prep["encoder"], src_seq, cfg)        # (B*L, D)
    logits = decoder_forward(prep["decoder"], prep["trg_word_prj"],
                             trg_seq, enc_out, cfg)                 # (B*L, V)
    # OutputLayer: identity
    return logits.reshape(B, L, -1)


# ---------------------------------- main -----------------------------------

if __name__ == "__main__":
    cfg = dict(
        n_src_vocab=16, n_trg_vocab=16,
        d_word_vec=32, d_model=32, d_inner=64,
        n_layers=2, n_head=2, d_k=16, d_v=16,
        n_position=200,
    )
    key = jax.random.PRNGKey(0)
    k_param, k_data = jax.random.split(key)
    params = init_transformer(k_param, cfg)
    prep = prepare_params(params, cfg)

    B, Lp1 = 2, 9   # sequence of 9 tokens -> src/trg length 8
    token_ids = jax.random.randint(k_data, (B, Lp1, 1), 0, cfg["n_src_vocab"])
    input_data = token_ids.astype(jnp.float32)              # (B, 9, 1) float ids

    fwd = jax.jit(functools.partial(transformer_forward, cfg=cfg))
    out = fwd(prep, input_data)
    out = jax.block_until_ready(out)
    assert out.shape == (B, Lp1 - 1, cfg["n_trg_vocab"])
    assert bool(jnp.all(jnp.isfinite(out)))
    print("KERNEL_OK")
</pallas_src>

<mosaic_0001>
module attributes {stable_mosaic.version = 11 : i64} {
  func.func @_encoder_stack_kernel(%arg0: i32, %arg1: memref<16x1xi32, #tpu.memory_space<vmem>>, %arg2: memref<16x32xbf16, #tpu.memory_space<vmem>>, %arg3: memref<8x32xf32, #tpu.memory_space<vmem>>, %arg4: memref<2x32xf32, #tpu.memory_space<vmem>>, %arg5: memref<1x32x96xbf16, #tpu.memory_space<vmem>>, %arg6: memref<1x2x16x32xbf16, #tpu.memory_space<vmem>>, %arg7: memref<1x32x64xbf16, #tpu.memory_space<vmem>>, %arg8: memref<1x64x32xbf16, #tpu.memory_space<vmem>>, %arg9: memref<1x6x64xf32, #tpu.memory_space<vmem>>, %arg10: memref<16x32xf32, #tpu.memory_space<vmem>>) attributes {dimension_semantics = [#tpu.dimension_semantics<arbitrary>], iteration_bounds = array<i64: 2>, scalar_prefetch = 0 : i64, scratch_operands = 0 : i64, tpu.core_type = #tpu.core_type<tc>, window_params = [{pipeline_mode = #tpu.pipeline_mode<synchronous>, transform_indices = @transform_0, window_bounds = array<i64: 16, 1>}, {pipeline_mode = #tpu.pipeline_mode<synchronous>, transform_indices = @transform_1, window_bounds = array<i64: 16, 32>}, {pipeline_mode = #tpu.pipeline_mode<synchronous>, transform_indices = @transform_2, window_bounds = array<i64: 8, 32>}, {pipeline_mode = #tpu.pipeline_mode<synchronous>, transform_indices = @transform_3, window_bounds = array<i64: 2, 32>}, {transform_indices = @transform_4, window_bounds = array<i64: 1, 32, 96>}, {transform_indices = @transform_5, window_bounds = array<i64: 1, 2, 16, 32>}, {transform_indices = @transform_6, window_bounds = array<i64: 1, 32, 64>}, {transform_indices = @transform_7, window_bounds = array<i64: 1, 64, 32>}, {transform_indices = @transform_8, window_bounds = array<i64: 1, 6, 64>}, {pipeline_mode = #tpu.pipeline_mode<synchronous>, transform_indices = @transform_9, window_bounds = array<i64: 16, 32>}]} {
    %c0_i32 = arith.constant 0 : i32
    %0 = arith.cmpi eq, %arg0, %c0_i32 : i32
    %1 = arith.extui %0 : i1 to i32
    %c0_i32_0 = arith.constant 0 : i32
    %2 = arith.cmpi ne, %1, %c0_i32_0 : i32
    scf.if %2 {
      %113 = tpu.iota {dimensions = array<i32: 1>} : vector<16x16xi32>
      %c0_39 = arith.constant 0 : index
      %c0_40 = arith.constant 0 : index
      %114 = vector.load %arg1[%c0_39, %c0_40] : memref<16x1xi32, #tpu.memory_space<vmem>>, vector<16x1xi32>
      %115 = vector.broadcast %114 : vector<16x1xi32> to vector<16x16xi32>
      %116 = arith.cmpi eq, %115, %113 : vector<16x16xi32>
      %117 = arith.extui %116 : vector<16x16xi1> to vector<16x16xi32>
      %118 = arith.sitofp %117 : vector<16x16xi32> to vector<16x16xf32>
      %119 = arith.truncf %118 : vector<16x16xf32> to vector<16x16xbf16>
      %c0_41 = arith.constant 0 : index
      %c0_42 = arith.constant 0 : index
      %120 = vector.load %arg2[%c0_41, %c0_42] : memref<16x32xbf16, #tpu.memory_space<vmem>>, vector<16x32xbf16>
      %cst_43 = arith.constant dense<0.000000e+00> : vector<16x32xf32>
      %121 = tpu.matmul %119, %120, %cst_43 {dimension_numbers = #tpu.dot_dimension_numbers<[1], [0], [0], [1], [0, 0, 1, 1], [], []>} : vector<16x16xbf16>, vector<16x32xbf16>, vector<16x32xf32> -> vector<16x32xf32>
      %c0_44 = arith.constant 0 : index
      %c0_45 = arith.constant 0 : index
      %122 = vector.load %arg3[%c0_44, %c0_45] : memref<8x32xf32, #tpu.memory_space<vmem>>, vector<8x32xf32>
      %123 = tpu.concatenate %122, %122 in 0 : vector<8x32xf32>, vector<8x32xf32> -> vector<16x32xf32>
      %124 = arith.addf %121, %123 : vector<16x32xf32>
      %c0_46 = arith.constant 0 : index
      %c0_47 = arith.constant 0 : index
      %125 = vector.load %arg4[%c0_46, %c0_47] : memref<2x32xf32, #tpu.memory_space<vmem>>, vector<1x32xf32>
      %c1 = arith.constant 1 : index
      %c0_48 = arith.constant 0 : index
      %126 = vector.load %arg4[%c1, %c0_48] : memref<2x32xf32, #tpu.memory_space<vmem>>, vector<1x32xf32>
      %cst_49 = arith.constant dense<0.000000e+00> : vector<16xf32>
      %127 = vector.multi_reduction <add>, %124, %cst_49 [1] : vector<16x32xf32> to vector<16xf32>
      %128 = vector.shape_cast %127 : vector<16xf32> to vector<16x1xf32>
      %cst_50 = arith.constant 3.200000e+01 : f32
      %129 = vector.broadcast %cst_50 : f32 to vector<16x1xf32>
      %130 = arith.divf %128, %129 : vector<16x1xf32>
      %131 = vector.broadcast %130 : vector<16x1xf32> to vector<16x32xf32>
      %132 = arith.subf %124, %131 : vector<16x32xf32>
      %133 = arith.mulf %132, %132 : vector<16x32xf32>
      %cst_51 = arith.constant dense<0.000000e+00> : vector<16xf32>
      %134 = vector.multi_reduction <add>, %133, %cst_51 [1] : vector<16x32xf32> to vector<16xf32>
      %135 = vector.shape_cast %134 : vector<16xf32> to vector<16x1xf32>
      %cst_52 = arith.constant 3.200000e+01 : f32
      %136 = vector.broadcast %cst_52 : f32 to vector<16x1xf32>
      %137 = arith.divf %135, %136 : vector<16x1xf32>
      %cst_53 = arith.constant 9.99999997E-7 : f32
      %138 = vector.broadcast %cst_53 : f32 to vector<16x1xf32>
      %139 = arith.addf %137, %138 : vector<16x1xf32>
      %140 = math.rsqrt %139 : vector<16x1xf32>
      %141 = vector.broadcast %140 : vector<16x1xf32> to vector<16x32xf32>
      %142 = arith.mulf %132, %141 : vector<16x32xf32>
      %143 = vector.broadcast %125 : vector<1x32xf32> to vector<16x32xf32>
      %144 = arith.mulf %142, %143 : vector<16x32xf32>
      %145 = vector.broadcast %126 : vector<1x32xf32> to vector<16x32xf32>
      %146 = arith.addf %144, %145 : vector<16x32xf32>
      %c0_54 = arith.constant 0 : index
      %c0_55 = arith.constant 0 : index
      %147 = vector.load %arg10[%c0_54, %c0_55] : memref<16x32xf32, #tpu.memory_space<vmem>>, vector<16x32xf32>
      tpu.vector_store %arg10[%c0_54, %c0_55], %146 {strides = array<i32>} : memref<16x32xf32, #tpu.memory_space<vmem>>, vector<16x32xf32>,
    } else {
    }
    %c0 = arith.constant 0 : index
    %c0_1 = arith.constant 0 : index
    %3 = vector.load %arg10[%c0, %c0_1] : memref<16x32xf32, #tpu.memory_space<vmem>>, vector<16x32xf32>
    %c0_2 = arith.constant 0 : index
    %c0_3 = arith.constant 0 : index
    %c0_4 = arith.constant 0 : index
    %4 = vector.load %arg9[%c0_2, %c0_3, %c0_4] : memref<1x6x64xf32, #tpu.memory_space<vmem>>, vector<1x6x64xf32>
    %5 = vector.shape_cast %4 : vector<1x6x64xf32> to vector<6x64xf32>
    %6 = arith.truncf %3 : vector<16x32xf32> to vector<16x32xbf16>
    %c0_5 = arith.constant 0 : index
    %c0_6 = arith.constant 0 : index
    %c0_7 = arith.constant 0 : index
    %7 = vector.load %arg5[%c0_5, %c0_6, %c0_7] : memref<1x32x96xbf16, #tpu.memory_space<vmem>>, vector<1x32x96xbf16>
    %8 = vector.shape_cast %7 : vector<1x32x96xbf16> to vector<32x96xbf16>
    %cst = arith.constant dense<0.000000e+00> : vector<16x96xf32>
    %9 = tpu.matmul %6, %8, %cst {dimension_numbers = #tpu.dot_dimension_numbers<[1], [0], [0], [1], [0, 0, 1, 1], [], []>} : vector<16x32xbf16>, vector<32x96xbf16>, vector<16x96xf32> -> vector<16x96xf32>
    %10 = vector.extract_strided_slice %9 {offsets = [0, 0], sizes = [16, 32], strides = [1, 1]} : vector<16x96xf32> to vector<16x32xf32>
    %11 = vector.extract_strided_slice %9 {offsets = [0, 32], sizes = [16, 32], strides = [1, 1]} : vector<16x96xf32> to vector<16x32xf32>
    %12 = vector.extract_strided_slice %9 {offsets = [0, 64], sizes = [16, 32], strides = [1, 1]} : vector<16x96xf32> to vector<16x32xf32>
    %c0_8 = arith.constant 0 : index
    %c0_9 = arith.constant 0 : index
    %c0_10 = arith.constant 0 : index
    %c0_11 = arith.constant 0 : index
    %13 = vector.load %arg6[%c0_8, %c0_9, %c0_10, %c0_11] : memref<1x2x16x32xbf16, #tpu.memory_space<vmem>>, vector<1x2x16x32xbf16>
    %14 = vector.shape_cast %13 : vector<1x2x16x32xbf16> to vector<2x16x32xbf16>
    %15 = vector.extract_strided_slice %10 {offsets = [0, 0], sizes = [16, 16], strides = [1, 1]} : vector<16x32xf32> to vector<16x16xf32>
    %16 = vector.shape_cast %15 : vector<16x16xf32> to vector<2x8x16xf32>
    %17 = vector.extract_strided_slice %10 {offsets = [0, 16], sizes = [16, 16], strides = [1, 1]} : vector<16x32xf32> to vector<16x16xf32>
    %18 = vector.shape_cast %17 : vector<16x16xf32> to vector<2x8x16xf32>
    %19 = tpu.concatenate %16, %18 in 0 : vector<2x8x16xf32>, vector<2x8x16xf32> -> vector<4x8x16xf32>
    %20 = vector.extract_strided_slice %11 {offsets = [0, 0], sizes = [16, 16], strides = [1, 1]} : vector<16x32xf32> to vector<16x16xf32>
    %21 = vector.shape_cast %20 : vector<16x16xf32> to vector<2x8x16xf32>
    %22 = vector.extract_strided_slice %11 {offsets = [0, 16], sizes = [16, 16], strides = [1, 1]} : vector<16x32xf32> to vector<16x16xf32>
    %23 = vector.shape_cast %22 : vector<16x16xf32> to vector<2x8x16xf32>
    %24 = tpu.concatenate %21, %23 in 0 : vector<2x8x16xf32>, vector<2x8x16xf32> -> vector<4x8x16xf32>
    %25 = vector.extract_strided_slice %12 {offsets = [0, 0], sizes = [16, 16], strides = [1, 1]} : vector<16x32xf32> to vector<16x16xf32>
    %26 = vector.shape_cast %25 : vector<16x16xf32> to vector<2x8x16xf32>
    %27 = vector.extract_strided_slice %12 {offsets = [0, 16], sizes = [16, 16], strides = [1, 1]} : vector<16x32xf32> to vector<16x16xf32>
    %28 = vector.shape_cast %27 : vector<16x16xf32> to vector<2x8x16xf32>
    %29 = tpu.concatenate %26, %28 in 0 : vector<2x8x16xf32>, vector<2x8x16xf32> -> vector<4x8x16xf32>
    %30 = arith.truncf %19 : vector<4x8x16xf32> to vector<4x8x16xbf16>
    %31 = arith.truncf %24 : vector<4x8x16xf32> to vector<4x8x16xbf16>
    %cst_12 = arith.constant dense<0.000000e+00> : vector<4x8x8xf32>
    %32 = tpu.matmul %30, %31, %cst_12 {dimension_numbers = #tpu.dot_dimension_numbers<[2], [2], [1], [1], [0, 0, 0, 1, 1, 1], [0], [0]>} : vector<4x8x16xbf16>, vector<4x8x16xbf16>, vector<4x8x8xf32> -> vector<4x8x8xf32>
    %cst_13 = arith.constant dense<0xFF800000> : vector<4x8xf32>
    %33 = vector.multi_reduction <maximumf>, %32, %cst_13 [2] : vector<4x8x8xf32> to vector<4x8xf32>
    %34 = vector.shape_cast %33 : vector<4x8xf32> to vector<4x8x1xf32>
    %35 = vector.broadcast %34 : vector<4x8x1xf32> to vector<4x8x8xf32>
    %36 = arith.subf %32, %35 : vector<4x8x8xf32>
    %37 = math.exp %36 : vector<4x8x8xf32>
    %cst_14 = arith.constant dense<0.000000e+00> : vector<4x8xf32>
    %38 = vector.multi_reduction <add>, %37, %cst_14 [2] : vector<4x8x8xf32> to vector<4x8xf32>
    %39 = vector.shape_cast %38 : vector<4x8xf32> to vector<4x8x1xf32>
    %40 = tpu.reciprocal %39 {approx = true} : vector<4x8x1xf32> -> vector<4x8x1xf32>
    %41 = vector.broadcast %40 : vector<4x8x1xf32> to vector<4x8x8xf32>
    %42 = arith.mulf %37, %41 : vector<4x8x8xf32>
    %43 = arith.truncf %42 : vector<4x8x8xf32> to vector<4x8x8xbf16>
    %44 = arith.truncf %29 : vector<4x8x16xf32> to vector<4x8x16xbf16>
    %cst_15 = arith.constant dense<0.000000e+00> : vector<4x8x16xf32>
    %45 = tpu.matmul %43, %44, %cst_15 {dimension_numbers = #tpu.dot_dimension_numbers<[2], [1], [1], [2], [0, 0, 0, 1, 1, 2], [0], [0]>} : vector<4x8x8xbf16>, vector<4x8x16xbf16>, vector<4x8x16xf32> -> vector<4x8x16xf32>
    %46 = vector.shape_cast %45 : vector<4x8x16xf32> to vector<2x16x16xf32>
    %47 = arith.truncf %46 : vector<2x16x16xf32> to vector<2x16x16xbf16>
    %cst_16 = arith.constant dense<0.000000e+00> : vector<2x16x32xf32>
    %48 = tpu.matmul %47, %14, %cst_16 {dimension_numbers = #tpu.dot_dimension_numbers<[2], [1], [1], [2], [0, 0, 0, 1, 1, 2], [0], [0]>} : vector<2x16x16xbf16>, vector<2x16x32xbf16>, vector<2x16x32xf32> -> vector<2x16x32xf32>
    %cst_17 = arith.constant dense<0.000000e+00> : vector<16x32xf32>
    %49 = vector.multi_reduction <add>, %48, %cst_17 [0] : vector<2x16x32xf32> to vector<16x32xf32>
    %50 = arith.addf %49, %3 : vector<16x32xf32>
    %51 = vector.extract_strided_slice %5 {offsets = [0, 0], sizes = [1, 32], strides = [1, 1]} : vector<6x64xf32> to vector<1x32xf32>
    %52 = vector.extract_strided_slice %5 {offsets = [1, 0], sizes = [1, 32], strides = [1, 1]} : vector<6x64xf32> to vector<1x32xf32>
    %cst_18 = arith.constant dense<0.000000e+00> : vector<16xf32>
    %53 = vector.multi_reduction <add>, %50, %cst_18 [1] : vector<16x32xf32> to vector<16xf32>
    %54 = vector.shape_cast %53 : vector<16xf32> to vector<16x1xf32>
    %cst_19 = arith.constant 3.200000e+01 : f32
    %55 = vector.broadcast %cst_19 : f32 to vector<16x1xf32>
    %56 = arith.divf %54, %55 : vector<16x1xf32>
    %57 = vector.broadcast %56 : vector<16x1xf32> to vector<16x32xf32>
    %58 = arith.subf %50, %57 : vector<16x32xf32>
    %59 = arith.mulf %58, %58 : vector<16x32xf32>
    %cst_20 = arith.constant dense<0.000000e+00> : vector<16xf32>
    %60 = vector.multi_reduction <add>, %59, %cst_20 [1] : vector<16x32xf32> to vector<16xf32>
    %61 = vector.shape_cast %60 : vector<16xf32> to vector<16x1xf32>
    %cst_21 = arith.constant 3.200000e+01 : f32
    %62 = vector.broadcast %cst_21 : f32 to vector<16x1xf32>
    %63 = arith.divf %61, %62 : vector<16x1xf32>
    %cst_22 = arith.constant 9.99999997E-7 : f32
    %64 = vector.broadcast %cst_22 : f32 to vector<16x1xf32>
    %65 = arith.addf %63, %64 : vector<16x1xf32>
    %66 = math.rsqrt %65 : vector<16x1xf32>
    %67 = vector.broadcast %66 : vector<16x1xf32> to vector<16x32xf32>
    %68 = arith.mulf %58, %67 : vector<16x32xf32>
    %69 = vector.broadcast %51 : vector<1x32xf32> to vector<16x32xf32>
    %70 = arith.mulf %68, %69 : vector<16x32xf32>
    %71 = vector.broadcast %52 : vector<1x32xf32> to vector<16x32xf32>
    %72 = arith.addf %70, %71 : vector<16x32xf32>
    %73 = arith.truncf %72 : vector<16x32xf32> to vector<16x32xbf16>
    %c0_23 = arith.constant 0 : index
    %c0_24 = arith.constant 0 : index
    %c0_25 = arith.constant 0 : index
    %74 = vector.load %arg7[%c0_23, %c0_24, %c0_25] : memref<1x32x64xbf16, #tpu.memory_space<vmem>>, vector<1x32x64xbf16>
    %75 = vector.shape_cast %74 : vector<1x32x64xbf16> to vector<32x64xbf16>
    %cst_26 = arith.constant dense<0.000000e+00> : vector<16x64xf32>
    %76 = tpu.matmul %73, %75, %cst_26 {dimension_numbers = #tpu.dot_dimension_numbers<[1], [0], [0], [1], [0, 0, 1, 1], [], []>} : vector<16x32xbf16>, vector<32x64xbf16>, vector<16x64xf32> -> vector<16x64xf32>
    %77 = vector.extract_strided_slice %5 {offsets = [2, 0], sizes = [1, 64], strides = [1, 1]} : vector<6x64xf32> to vector<1x64xf32>
    %78 = vector.broadcast %77 : vector<1x64xf32> to vector<16x64xf32>
    %79 = arith.addf %76, %78 : vector<16x64xf32>
    %cst_27 = arith.constant 0.000000e+00 : f32
    %80 = vector.broadcast %cst_27 : f32 to vector<16x64xf32>
    %81 = arith.maximumf %79, %80 : vector<16x64xf32>
    %82 = arith.truncf %81 : vector<16x64xf32> to vector<16x64xbf16>
    %c0_28 = arith.constant 0 : index
    %c0_29 = arith.constant 0 : index
    %c0_30 = arith.constant 0 : index
    %83 = vector.load %arg8[%c0_28, %c0_29, %c0_30] : memref<1x64x32xbf16, #tpu.memory_space<vmem>>, vector<1x64x32xbf16>
    %84 = vector.shape_cast %83 : vector<1x64x32xbf16> to vector<64x32xbf16>
    %cst_31 = arith.constant dense<0.000000e+00> : vector<16x32xf32>
    %85 = tpu.matmul %82, %84, %cst_31 {dimension_numbers = #tpu.dot_dimension_numbers<[1], [0], [0], [1], [0, 0, 1, 1], [], []>} : vector<16x64xbf16>, vector<64x32xbf16>, vector<16x32xf32> -> vector<16x32xf32>
    %86 = vector.extract_strided_slice %5 {offsets = [3, 0], sizes = [1, 32], strides = [1, 1]} : vector<6x64xf32> to vector<1x32xf32>
    %87 = vector.broadcast %86 : vector<1x32xf32> to vector<16x32xf32>
    %88 = arith.addf %85, %87 : vector<16x32xf32>
    %89 = arith.addf %88, %72 : vector<16x32xf32>
    %90 = vector.extract_strided_slice %5 {offsets = [4, 0], sizes = [1, 32], strides = [1, 1]} : vector<6x64xf32> to vector<1x32xf32>
    %91 = vector.extract_strided_slice %5 {offsets = [5, 0], sizes = [1, 32], strides = [1, 1]} : vector<6x64xf32> to vector<1x32xf32>
    %cst_32 = arith.constant dense<0.000000e+00> : vector<16xf32>
    %92 = vector.multi_reduction <add>, %89, %cst_32 [1] : vector<16x32xf32> to vector<16xf32>
    %93 = vector.shape_cast %92 : vector<16xf32> to vector<16x1xf32>
    %cst_33 = arith.constant 3.200000e+01 : f32
    %94 = vector.broadcast %cst_33 : f32 to vector<16x1xf32>
    %95 = arith.divf %93, %94 : vector<16x1xf32>
    %96 = vector.broadcast %95 : vector<16x1xf32> to vector<16x32xf32>
    %97 = arith.subf %89, %96 : vector<16x32xf32>
    %98 = arith.mulf %97, %97 : vector<16x32xf32>
    %cst_34 = arith.constant dense<0.000000e+00> : vector<16xf32>
    %99 = vector.multi_reduction <add>, %98, %cst_34 [1] : vector<16x32xf32> to vector<16xf32>
    %100 = vector.shape_cast %99 : vector<16xf32> to vector<16x1xf32>
    %cst_35 = arith.constant 3.200000e+01 : f32
    %101 = vector.broadcast %cst_35 : f32 to vector<16x1xf32>
    %102 = arith.divf %100, %101 : vector<16x1xf32>
    %cst_36 = arith.constant 9.99999997E-7 : f32
    %103 = vector.broadcast %cst_36 : f32 to vector<16x1xf32>
    %104 = arith.addf %102, %103 : vector<16x1xf32>
    %105 = math.rsqrt %104 : vector<16x1xf32>
    %106 = vector.broadcast %105 : vector<16x1xf32> to vector<16x32xf32>
    %107 = arith.mulf %97, %106 : vector<16x32xf32>
    %108 = vector.broadcast %90 : vector<1x32xf32> to vector<16x32xf32>
    %109 = arith.mulf %107, %108 : vector<16x32xf32>
    %110 = vector.broadcast %91 : vector<1x32xf32> to vector<16x32xf32>
    %111 = arith.addf %109, %110 : vector<16x32xf32>
    %c0_37 = arith.constant 0 : index
    %c0_38 = arith.constant 0 : index
    %112 = vector.load %arg10[%c0_37, %c0_38] : memref<16x32xf32, #tpu.memory_space<vmem>>, vector<16x32xf32>
    tpu.vector_store %arg10[%c0_37, %c0_38], %111 {strides = array<i32>} : memref<16x32xf32, #tpu.memory_space<vmem>>, vector<16x32xf32>,
    return
  }
  func.func @transform_0(%arg0: i32) -> (i32, i32) {
    %c0_i32 = arith.constant 0 : i32
    %c0_i32_0 = arith.constant 0 : i32
    %c0_i32_1 = arith.constant 0 : i32
    return %c0_i32, %c0_i32_0 : i32, i32
  }
  func.func @transform_1(%arg0: i32) -> (i32, i32) {
    %c0_i32 = arith.constant 0 : i32
    %c0_i32_0 = arith.constant 0 : i32
    %c0_i32_1 = arith.constant 0 : i32
    return %c0_i32, %c0_i32_0 : i32, i32
  }
  func.func @transform_2(%arg0: i32) -> (i32, i32) {
    %c0_i32 = arith.constant 0 : i32
    %c0_i32_0 = arith.constant 0 : i32
    %c0_i32_1 = arith.constant 0 : i32
    return %c0_i32, %c0_i32_0 : i32, i32
  }
  func.func @transform_3(%arg0: i32) -> (i32, i32) {
    %c0_i32 = arith.constant 0 : i32
    %c0_i32_0 = arith.constant 0 : i32
    %c0_i32_1 = arith.constant 0 : i32
    return %c0_i32, %c0_i32_0 : i32, i32
  }
  func.func @transform_4(%arg0: i32) -> (i32, i32, i32) {
    %c0_i32 = arith.constant 0 : i32
    %c0_i32_0 = arith.constant 0 : i32
    %c0_i32_1 = arith.constant 0 : i32
    return %arg0, %c0_i32, %c0_i32_0 : i32, i32, i32
  }
  func.func @transform_5(%arg0: i32) -> (i32, i32, i32, i32) {
    %c0_i32 = arith.constant 0 : i32
    %c0_i32_0 = arith.constant 0 : i32
    %c0_i32_1 = arith.constant 0 : i32
    %c0_i32_2 = arith.constant 0 : i32
    return %arg0, %c0_i32, %c0_i32_0, %c0_i32_1 : i32, i32, i32, i32
  }
  func.func @transform_6(%arg0: i32) -> (i32, i32, i32) {
    %c0_i32 = arith.constant 0 : i32
    %c0_i32_0 = arith.constant 0 : i32
    %c0_i32_1 = arith.constant 0 : i32
    return %arg0, %c0_i32, %c0_i32_0 : i32, i32, i32
  }
  func.func @transform_7(%arg0: i32) -> (i32, i32, i32) {
    %c0_i32 = arith.constant 0 : i32
    %c0_i32_0 = arith.constant 0 : i32
    %c0_i32_1 = arith.constant 0 : i32
    return %arg0, %c0_i32, %c0_i32_0 : i32, i32, i32
  }
  func.func @transform_8(%arg0: i32) -> (i32, i32, i32) {
    %c0_i32 = arith.constant 0 : i32
    %c0_i32_0 = arith.constant 0 : i32
    %c0_i32_1 = arith.constant 0 : i32
    return %arg0, %c0_i32, %c0_i32_0 : i32, i32, i32
  }
  func.func @transform_9(%arg0: i32) -> (i32, i32) {
    %c0_i32 = arith.constant 0 : i32
    %c0_i32_0 = arith.constant 0 : i32
    %c0_i32_1 = arith.constant 0 : i32
    return %c0_i32, %c0_i32_0 : i32, i32
  }
}

module attributes {stable_mosaic.version = 11 : i64} {
  func.func @_decoder_stack_kernel(%arg0: i32, %arg1: memref<16x1xi32, #tpu.memory_space<vmem>>, %arg2: memref<16x32xbf16, #tpu.memory_space<vmem>>, %arg3: memref<8x32xf32, #tpu.memory_space<vmem>>, %arg4: memref<2x32xf32, #tpu.memory_space<vmem>>, %arg5: memref<16x32xf32, #tpu.memory_space<vmem>>, %arg6: memref<1x32x96xbf16, #tpu.memory_space<vmem>>, %arg7: memref<1x2x16x32xbf16, #tpu.memory_space<vmem>>, %arg8: memref<1x32x96xbf16, #tpu.memory_space<vmem>>, %arg9: memref<1x2x16x32xbf16, #tpu.memory_space<vmem>>, %arg10: memref<1x32x64xbf16, #tpu.memory_space<vmem>>, %arg11: memref<1x64x32xbf16, #tpu.memory_space<vmem>>, %arg12: memref<1x8x64xf32, #tpu.memory_space<vmem>>, %arg13: memref<32x16xbf16, #tpu.memory_space<vmem>>, %arg14: memref<16x16xf32, #tpu.memory_space<vmem>>, %arg15: memref<16x32xf32, #tpu.memory_space<vmem>>) attributes {dimension_semantics = [#tpu.dimension_semantics<arbitrary>], iteration_bounds = array<i64: 2>, scalar_prefetch = 0 : i64, scratch_operands = 1 : i64, tpu.core_type = #tpu.core_type<tc>, window_params = [{pipeline_mode = #tpu.pipeline_mode<synchronous>, transform_indices = @transform_0, window_bounds = array<i64: 16, 1>}, {pipeline_mode = #tpu.pipeline_mode<synchronous>, transform_indices = @transform_1, window_bounds = array<i64: 16, 32>}, {pipeline_mode = #tpu.pipeline_mode<synchronous>, transform_indices = @transform_2, window_bounds = array<i64: 8, 32>}, {pipeline_mode = #tpu.pipeline_mode<synchronous>, transform_indices = @transform_3, window_bounds = array<i64: 2, 32>}, {pipeline_mode = #tpu.pipeline_mode<synchronous>, transform_indices = @transform_4, window_bounds = array<i64: 16, 32>}, {transform_indices = @transform_5, window_bounds = array<i64: 1, 32, 96>}, {transform_indices = @transform_6, window_bounds = array<i64: 1, 2, 16, 32>}, {transform_indices = @transform_7, window_bounds = array<i64: 1, 32, 96>}, {transform_indices = @transform_8, window_bounds = array<i64: 1, 2, 16, 32>}, {transform_indices = @transform_9, window_bounds = array<i64: 1, 32, 64>}, {transform_indices = @transform_10, window_bounds = array<i64: 1, 64, 32>}, {transform_indices = @transform_11, window_bounds = array<i64: 1, 8, 64>}, {pipeline_mode = #tpu.pipeline_mode<synchronous>, transform_indices = @transform_12, window_bounds = array<i64: 32, 16>}, {pipeline_mode = #tpu.pipeline_mode<synchronous>, transform_indices = @transform_13, window_bounds = array<i64: 16, 16>}]} {
    %c0_i32 = arith.constant 0 : i32
    %0 = arith.cmpi eq, %arg0, %c0_i32 : i32
    %1 = arith.extui %0 : i1 to i32
    %c0_i32_0 = arith.constant 0 : i32
    %2 = arith.cmpi ne, %1, %c0_i32_0 : i32
    scf.if %2 {
      %187 = tpu.iota {dimensions = array<i32: 1>} : vector<16x16xi32>
      %c0_62 = arith.constant 0 : index
      %c0_63 = arith.constant 0 : index
      %188 = vector.load %arg1[%c0_62, %c0_63] : memref<16x1xi32, #tpu.memory_space<vmem>>, vector<16x1xi32>
      %189 = vector.broadcast %188 : vector<16x1xi32> to vector<16x16xi32>
      %190 = arith.cmpi eq, %189, %187 : vector<16x16xi32>
      %191 = arith.extui %190 : vector<16x16xi1> to vector<16x16xi32>
      %192 = arith.sitofp %191 : vector<16x16xi32> to vector<16x16xf32>
      %193 = arith.truncf %192 : vector<16x16xf32> to vector<16x16xbf16>
      %c0_64 = arith.constant 0 : index
      %c0_65 = arith.constant 0 : index
      %194 = vector.load %arg2[%c0_64, %c0_65] : memref<16x32xbf16, #tpu.memory_space<vmem>>, vector<16x32xbf16>
      %cst_66 = arith.constant dense<0.000000e+00> : vector<16x32xf32>
      %195 = tpu.matmul %193, %194, %cst_66 {dimension_numbers = #tpu.dot_dimension_numbers<[1], [0], [0], [1], [0, 0, 1, 1], [], []>} : vector<16x16xbf16>, vector<16x32xbf16>, vector<16x32xf32> -> vector<16x32xf32>
      %c0_67 = arith.constant 0 : index
      %c0_68 = arith.constant 0 : index
      %196 = vector.load %arg3[%c0_67, %c0_68] : memref<8x32xf32, #tpu.memory_space<vmem>>, vector<8x32xf32>
      %197 = tpu.concatenate %196, %196 in 0 : vector<8x32xf32>, vector<8x32xf32> -> vector<16x32xf32>
      %198 = arith.addf %195, %197 : vector<16x32xf32>
      %c0_69 = arith.constant 0 : index
      %c0_70 = arith.constant 0 : index
      %199 = vector.load %arg4[%c0_69, %c0_70] : memref<2x32xf32, #tpu.memory_space<vmem>>, vector<1x32xf32>
      %c1 = arith.constant 1 : index
      %c0_71 = arith.constant 0 : index
      %200 = vector.load %arg4[%c1, %c0_71] : memref<2x32xf32, #tpu.memory_space<vmem>>, vector<1x32xf32>
      %cst_72 = arith.constant dense<0.000000e+00> : vector<16xf32>
      %201 = vector.multi_reduction <add>, %198, %cst_72 [1] : vector<16x32xf32> to vector<16xf32>
      %202 = vector.shape_cast %201 : vector<16xf32> to vector<16x1xf32>
      %cst_73 = arith.constant 3.200000e+01 : f32
      %203 = vector.broadcast %cst_73 : f32 to vector<16x1xf32>
      %204 = arith.divf %202, %203 : vector<16x1xf32>
      %205 = vector.broadcast %204 : vector<16x1xf32> to vector<16x32xf32>
      %206 = arith.subf %198, %205 : vector<16x32xf32>
      %207 = arith.mulf %206, %206 : vector<16x32xf32>
      %cst_74 = arith.constant dense<0.000000e+00> : vector<16xf32>
      %208 = vector.multi_reduction <add>, %207, %cst_74 [1] : vector<16x32xf32> to vector<16xf32>
      %209 = vector.shape_cast %208 : vector<16xf32> to vector<16x1xf32>
      %cst_75 = arith.constant 3.200000e+01 : f32
      %210 = vector.broadcast %cst_75 : f32 to vector<16x1xf32>
      %211 = arith.divf %209, %210 : vector<16x1xf32>
      %cst_76 = arith.constant 9.99999997E-7 : f32
      %212 = vector.broadcast %cst_76 : f32 to vector<16x1xf32>
      %213 = arith.addf %211, %212 : vector<16x1xf32>
      %214 = math.rsqrt %213 : vector<16x1xf32>
      %215 = vector.broadcast %214 : vector<16x1xf32> to vector<16x32xf32>
      %216 = arith.mulf %206, %215 : vector<16x32xf32>
      %217 = vector.broadcast %199 : vector<1x32xf32> to vector<16x32xf32>
      %218 = arith.mulf %216, %217 : vector<16x32xf32>
      %219 = vector.broadcast %200 : vector<1x32xf32> to vector<16x32xf32>
      %220 = arith.addf %218, %219 : vector<16x32xf32>
      %c0_77 = arith.constant 0 : index
      %c0_78 = arith.constant 0 : index
      %221 = vector.load %arg15[%c0_77, %c0_78] : memref<16x32xf32, #tpu.memory_space<vmem>>, vector<16x32xf32>
      tpu.vector_store %arg15[%c0_77, %c0_78], %220 {strides = array<i32>} : memref<16x32xf32, #tpu.memory_space<vmem>>, vector<16x32xf32>,
    } else {
    }
    %c0 = arith.constant 0 : index
    %c0_1 = arith.constant 0 : index
    %3 = vector.load %arg15[%c0, %c0_1] : memref<16x32xf32, #tpu.memory_space<vmem>>, vector<16x32xf32>
    %c0_2 = arith.constant 0 : index
    %c0_3 = arith.constant 0 : index
    %c0_4 = arith.constant 0 : index
    %4 = vector.load %arg12[%c0_2, %c0_3, %c0_4] : memref<1x8x64xf32, #tpu.memory_space<vmem>>, vector<1x8x64xf32>
    %5 = vector.shape_cast %4 : vector<1x8x64xf32> to vector<8x64xf32>
    %6 = arith.truncf %3 : vector<16x32xf32> to vector<16x32xbf16>
    %c0_5 = arith.constant 0 : index
    %c0_6 = arith.constant 0 : index
    %c0_7 = arith.constant 0 : index
    %7 = vector.load %arg6[%c0_5, %c0_6, %c0_7] : memref<1x32x96xbf16, #tpu.memory_space<vmem>>, vector<1x32x96xbf16>
    %8 = vector.shape_cast %7 : vector<1x32x96xbf16> to vector<32x96xbf16>
    %cst = arith.constant dense<0.000000e+00> : vector<16x96xf32>
    %9 = tpu.matmul %6, %8, %cst {dimension_numbers = #tpu.dot_dimension_numbers<[1], [0], [0], [1], [0, 0, 1, 1], [], []>} : vector<16x32xbf16>, vector<32x96xbf16>, vector<16x96xf32> -> vector<16x96xf32>
    %10 = vector.extract_strided_slice %9 {offsets = [0, 0], sizes = [16, 32], strides = [1, 1]} : vector<16x96xf32> to vector<16x32xf32>
    %11 = vector.extract_strided_slice %9 {offsets = [0, 32], sizes = [16, 32], strides = [1, 1]} : vector<16x96xf32> to vector<16x32xf32>
    %12 = vector.extract_strided_slice %9 {offsets = [0, 64], sizes = [16, 32], strides = [1, 1]} : vector<16x96xf32> to vector<16x32xf32>
    %c0_8 = arith.constant 0 : index
    %c0_9 = arith.constant 0 : index
    %c0_10 = arith.constant 0 : index
    %c0_11 = arith.constant 0 : index
    %13 = vector.load %arg7[%c0_8, %c0_9, %c0_10, %c0_11] : memref<1x2x16x32xbf16, #tpu.memory_space<vmem>>, vector<1x2x16x32xbf16>
    %14 = vector.shape_cast %13 : vector<1x2x16x32xbf16> to vector<2x16x32xbf16>
    %15 = vector.extract_strided_slice %10 {offsets = [0, 0], sizes = [16, 16], strides = [1, 1]} : vector<16x32xf32> to vector<16x16xf32>
    %16 = vector.shape_cast %15 : vector<16x16xf32> to vector<2x8x16xf32>
    %17 = vector.extract_strided_slice %10 {offsets = [0, 16], sizes = [16, 16], strides = [1, 1]} : vector<16x32xf32> to vector<16x16xf32>
    %18 = vector.shape_cast %17 : vector<16x16xf32> to vector<2x8x16xf32>
    %19 = tpu.concatenate %16, %18 in 0 : vector<2x8x16xf32>, vector<2x8x16xf32> -> vector<4x8x16xf32>
    %20 = vector.extract_strided_slice %11 {offsets = [0, 0], sizes = [16, 16], strides = [1, 1]} : vector<16x32xf32> to vector<16x16xf32>
    %21 = vector.shape_cast %20 : vector<16x16xf32> to vector<2x8x16xf32>
    %22 = vector.extract_strided_slice %11 {offsets = [0, 16], sizes = [16, 16], strides = [1, 1]} : vector<16x32xf32> to vector<16x16xf32>
    %23 = vector.shape_cast %22 : vector<16x16xf32> to vector<2x8x16xf32>
    %24 = tpu.concatenate %21, %23 in 0 : vector<2x8x16xf32>, vector<2x8x16xf32> -> vector<4x8x16xf32>
    %25 = vector.extract_strided_slice %12 {offsets = [0, 0], sizes = [16, 16], strides = [1, 1]} : vector<16x32xf32> to vector<16x16xf32>
    %26 = vector.shape_cast %25 : vector<16x16xf32> to vector<2x8x16xf32>
    %27 = vector.extract_strided_slice %12 {offsets = [0, 16], sizes = [16, 16], strides = [1, 1]} : vector<16x32xf32> to vector<16x16xf32>
    %28 = vector.shape_cast %27 : vector<16x16xf32> to vector<2x8x16xf32>
    %29 = tpu.concatenate %26, %28 in 0 : vector<2x8x16xf32>, vector<2x8x16xf32> -> vector<4x8x16xf32>
    %30 = arith.truncf %19 : vector<4x8x16xf32> to vector<4x8x16xbf16>
    %31 = arith.truncf %24 : vector<4x8x16xf32> to vector<4x8x16xbf16>
    %cst_12 = arith.constant dense<0.000000e+00> : vector<4x8x8xf32>
    %32 = tpu.matmul %30, %31, %cst_12 {dimension_numbers = #tpu.dot_dimension_numbers<[2], [2], [1], [1], [0, 0, 0, 1, 1, 1], [0], [0]>} : vector<4x8x16xbf16>, vector<4x8x16xbf16>, vector<4x8x8xf32> -> vector<4x8x8xf32>
    %cst_13 = arith.constant dense<0xFF800000> : vector<4x8xf32>
    %33 = vector.multi_reduction <maximumf>, %32, %cst_13 [2] : vector<4x8x8xf32> to vector<4x8xf32>
    %34 = vector.shape_cast %33 : vector<4x8xf32> to vector<4x8x1xf32>
    %35 = vector.broadcast %34 : vector<4x8x1xf32> to vector<4x8x8xf32>
    %36 = arith.subf %32, %35 : vector<4x8x8xf32>
    %37 = math.exp %36 : vector<4x8x8xf32>
    %cst_14 = arith.constant dense<0.000000e+00> : vector<4x8xf32>
    %38 = vector.multi_reduction <add>, %37, %cst_14 [2] : vector<4x8x8xf32> to vector<4x8xf32>
    %39 = vector.shape_cast %38 : vector<4x8xf32> to vector<4x8x1xf32>
    %40 = tpu.reciprocal %39 {approx = true} : vector<4x8x1xf32> -> vector<4x8x1xf32>
    %41 = vector.broadcast %40 : vector<4x8x1xf32> to vector<4x8x8xf32>
    %42 = arith.mulf %37, %41 : vector<4x8x8xf32>
    %43 = arith.truncf %42 : vector<4x8x8xf32> to vector<4x8x8xbf16>
    %44 = arith.truncf %29 : vector<4x8x16xf32> to vector<4x8x16xbf16>
    %cst_15 = arith.constant dense<0.000000e+00> : vector<4x8x16xf32>
    %45 = tpu.matmul %43, %44, %cst_15 {dimension_numbers = #tpu.dot_dimension_numbers<[2], [1], [1], [2], [0, 0, 0, 1, 1, 2], [0], [0]>} : vector<4x8x8xbf16>, vector<4x8x16xbf16>, vector<4x8x16xf32> -> vector<4x8x16xf32>
    %46 = vector.shape_cast %45 : vector<4x8x16xf32> to vector<2x16x16xf32>
    %47 = arith.truncf %46 : vector<2x16x16xf32> to vector<2x16x16xbf16>
    %cst_16 = arith.constant dense<0.000000e+00> : vector<2x16x32xf32>
    %48 = tpu.matmul %47, %14, %cst_16 {dimension_numbers = #tpu.dot_dimension_numbers<[2], [1], [1], [2], [0, 0, 0, 1, 1, 2], [0], [0]>} : vector<2x16x16xbf16>, vector<2x16x32xbf16>, vector<2x16x32xf32> -> vector<2x16x32xf32>
    %cst_17 = arith.constant dense<0.000000e+00> : vector<16x32xf32>
    %49 = vector.multi_reduction <add>, %48, %cst_17 [0] : vector<2x16x32xf32> to vector<16x32xf32>
    %50 = arith.addf %49, %3 : vector<16x32xf32>
    %51 = vector.extract_strided_slice %5 {offsets = [0, 0], sizes = [1, 32], strides = [1, 1]} : vector<8x64xf32> to vector<1x32xf32>
    %52 = vector.extract_strided_slice %5 {offsets = [1, 0], sizes = [1, 32], strides = [1, 1]} : vector<8x64xf32> to vector<1x32xf32>
    %cst_18 = arith.constant dense<0.000000e+00> : vector<16xf32>
    %53 = vector.multi_reduction <add>, %50, %cst_18 [1] : vector<16x32xf32> to vector<16xf32>
    %54 = vector.shape_cast %53 : vector<16xf32> to vector<16x1xf32>
    %cst_19 = arith.constant 3.200000e+01 : f32
    %55 = vector.broadcast %cst_19 : f32 to vector<16x1xf32>
    %56 = arith.divf %54, %55 : vector<16x1xf32>
    %57 = vector.broadcast %56 : vector<16x1xf32> to vector<16x32xf32>
    %58 = arith.subf %50, %57 : vector<16x32xf32>
    %59 = arith.mulf %58, %58 : vector<16x32xf32>
    %cst_20 = arith.constant dense<0.000000e+00> : vector<16xf32>
    %60 = vector.multi_reduction <add>, %59, %cst_20 [1] : vector<16x32xf32> to vector<16xf32>
    %61 = vector.shape_cast %60 : vector<16xf32> to vector<16x1xf32>
    %cst_21 = arith.constant 3.200000e+01 : f32
    %62 = vector.broadcast %cst_21 : f32 to vector<16x1xf32>
    %63 = arith.divf %61, %62 : vector<16x1xf32>
    %cst_22 = arith.constant 9.99999997E-7 : f32
    %64 = vector.broadcast %cst_22 : f32 to vector<16x1xf32>
    %65 = arith.addf %63, %64 : vector<16x1xf32>
    %66 = math.rsqrt %65 : vector<16x1xf32>
    %67 = vector.broadcast %66 : vector<16x1xf32> to vector<16x32xf32>
    %68 = arith.mulf %58, %67 : vector<16x32xf32>
    %69 = vector.broadcast %51 : vector<1x32xf32> to vector<16x32xf32>
    %70 = arith.mulf %68, %69 : vector<16x32xf32>
    %71 = vector.broadcast %52 : vector<1x32xf32> to vector<16x32xf32>
    %72 = arith.addf %70, %71 : vector<16x32xf32>
    %c0_23 = arith.constant 0 : index
    %c0_24 = arith.constant 0 : index
    %c0_25 = arith.constant 0 : index
    %73 = vector.load %arg8[%c0_23, %c0_24, %c0_25] : memref<1x32x96xbf16, #tpu.memory_space<vmem>>, vector<1x32x96xbf16>
    %74 = vector.shape_cast %73 : vector<1x32x96xbf16> to vector<32x96xbf16>
    %75 = arith.truncf %72 : vector<16x32xf32> to vector<16x32xbf16>
    %76 = vector.extract_strided_slice %74 {offsets = [0, 0], sizes = [32, 32], strides = [1, 1]} : vector<32x96xbf16> to vector<32x32xbf16>
    %cst_26 = arith.constant dense<0.000000e+00> : vector<16x32xf32>
    %77 = tpu.matmul %75, %76, %cst_26 {dimension_numbers = #tpu.dot_dimension_numbers<[1], [0], [0], [1], [0, 0, 1, 1], [], []>} : vector<16x32xbf16>, vector<32x32xbf16>, vector<16x32xf32> -> vector<16x32xf32>
    %c0_27 = arith.constant 0 : index
    %c0_28 = arith.constant 0 : index
    %78 = vector.load %arg5[%c0_27, %c0_28] : memref<16x32xf32, #tpu.memory_space<vmem>>, vector<16x32xf32>
    %79 = arith.truncf %78 : vector<16x32xf32> to vector<16x32xbf16>
    %80 = vector.extract_strided_slice %74 {offsets = [0, 32], sizes = [32, 64], strides = [1, 1]} : vector<32x96xbf16> to vector<32x64xbf16>
    %cst_29 = arith.constant dense<0.000000e+00> : vector<16x64xf32>
    %81 = tpu.matmul %79, %80, %cst_29 {dimension_numbers = #tpu.dot_dimension_numbers<[1], [0], [0], [1], [0, 0, 1, 1], [], []>} : vector<16x32xbf16>, vector<32x64xbf16>, vector<16x64xf32> -> vector<16x64xf32>
    %82 = vector.extract_strided_slice %81 {offsets = [0, 0], sizes = [16, 32], strides = [1, 1]} : vector<16x64xf32> to vector<16x32xf32>
    %83 = vector.extract_strided_slice %81 {offsets = [0, 32], sizes = [16, 32], strides = [1, 1]} : vector<16x64xf32> to vector<16x32xf32>
    %c0_30 = arith.constant 0 : index
    %c0_31 = arith.constant 0 : index
    %c0_32 = arith.constant 0 : index
    %c0_33 = arith.constant 0 : index
    %84 = vector.load %arg9[%c0_30, %c0_31, %c0_32, %c0_33] : memref<1x2x16x32xbf16, #tpu.memory_space<vmem>>, vector<1x2x16x32xbf16>
    %85 = vector.shape_cast %84 : vector<1x2x16x32xbf16> to vector<2x16x32xbf16>
    %86 = vector.extract_strided_slice %77 {offsets = [0, 0], sizes = [16, 16], strides = [1, 1]} : vector<16x32xf32> to vector<16x16xf32>
    %87 = vector.shape_cast %86 : vector<16x16xf32> to vector<2x8x16xf32>
    %88 = vector.extract_strided_slice %77 {offsets = [0, 16], sizes = [16, 16], strides = [1, 1]} : vector<16x32xf32> to vector<16x16xf32>
    %89 = vector.shape_cast %88 : vector<16x16xf32> to vector<2x8x16xf32>
    %90 = tpu.concatenate %87, %89 in 0 : vector<2x8x16xf32>, vector<2x8x16xf32> -> vector<4x8x16xf32>
    %91 = vector.extract_strided_slice %82 {offsets = [0, 0], sizes = [16, 16], strides = [1, 1]} : vector<16x32xf32> to vector<16x16xf32>
    %92 = vector.shape_cast %91 : vector<16x16xf32> to vector<2x8x16xf32>
    %93 = vector.extract_strided_slice %82 {offsets = [0, 16], sizes = [16, 16], strides = [1, 1]} : vector<16x32xf32> to vector<16x16xf32>
    %94 = vector.shape_cast %93 : vector<16x16xf32> to vector<2x8x16xf32>
    %95 = tpu.concatenate %92, %94 in 0 : vector<2x8x16xf32>, vector<2x8x16xf32> -> vector<4x8x16xf32>
    %96 = vector.extract_strided_slice %83 {offsets = [0, 0], sizes = [16, 16], strides = [1, 1]} : vector<16x32xf32> to vector<16x16xf32>
    %97 = vector.shape_cast %96 : vector<16x16xf32> to vector<2x8x16xf32>
    %98 = vector.extract_strided_slice %83 {offsets = [0, 16], sizes = [16, 16], strides = [1, 1]} : vector<16x32xf32> to vector<16x16xf32>
    %99 = vector.shape_cast %98 : vector<16x16xf32> to vector<2x8x16xf32>
    %100 = tpu.concatenate %97, %99 in 0 : vector<2x8x16xf32>, vector<2x8x16xf32> -> vector<4x8x16xf32>
    %101 = arith.truncf %90 : vector<4x8x16xf32> to vector<4x8x16xbf16>
    %102 = arith.truncf %95 : vector<4x8x16xf32> to vector<4x8x16xbf16>
    %cst_34 = arith.constant dense<0.000000e+00> : vector<4x8x8xf32>
    %103 = tpu.matmul %101, %102, %cst_34 {dimension_numbers = #tpu.dot_dimension_numbers<[2], [2], [1], [1], [0, 0, 0, 1, 1, 1], [0], [0]>} : vector<4x8x16xbf16>, vector<4x8x16xbf16>, vector<4x8x8xf32> -> vector<4x8x8xf32>
    %cst_35 = arith.constant dense<0xFF800000> : vector<4x8xf32>
    %104 = vector.multi_reduction <maximumf>, %103, %cst_35 [2] : vector<4x8x8xf32> to vector<4x8xf32>
    %105 = vector.shape_cast %104 : vector<4x8xf32> to vector<4x8x1xf32>
    %106 = vector.broadcast %105 : vector<4x8x1xf32> to vector<4x8x8xf32>
    %107 = arith.subf %103, %106 : vector<4x8x8xf32>
    %108 = math.exp %107 : vector<4x8x8xf32>
    %cst_36 = arith.constant dense<0.000000e+00> : vector<4x8xf32>
    %109 = vector.multi_reduction <add>, %108, %cst_36 [2] : vector<4x8x8xf32> to vector<4x8xf32>
    %110 = vector.shape_cast %109 : vector<4x8xf32> to vector<4x8x1xf32>
    %111 = tpu.reciprocal %110 {approx = true} : vector<4x8x1xf32> -> vector<4x8x1xf32>
    %112 = vector.broadcast %111 : vector<4x8x1xf32> to vector<4x8x8xf32>
    %113 = arith.mulf %108, %112 : vector<4x8x8xf32>
    %114 = arith.truncf %113 : vector<4x8x8xf32> to vector<4x8x8xbf16>
    %115 = arith.truncf %100 : vector<4x8x16xf32> to vector<4x8x16xbf16>
    %cst_37 = arith.constant dense<0.000000e+00> : vector<4x8x16xf32>
    %116 = tpu.matmul %114, %115, %cst_37 {dimension_numbers = #tpu.dot_dimension_numbers<[2], [1], [1], [2], [0, 0, 0, 1, 1, 2], [0], [0]>} : vector<4x8x8xbf16>, vector<4x8x16xbf16>, vector<4x8x16xf32> -> vector<4x8x16xf32>
    %117 = vector.shape_cast %116 : vector<4x8x16xf32> to vector<2x16x16xf32>
    %118 = arith.truncf %117 : vector<2x16x16xf32> to vector<2x16x16xbf16>
    %cst_38 = arith.constant dense<0.000000e+00> : vector<2x16x32xf32>
    %119 = tpu.matmul %118, %85, %cst_38 {dimension_numbers = #tpu.dot_dimension_numbers<[2], [1], [1], [2], [0, 0, 0, 1, 1, 2], [0], [0]>} : vector<2x16x16xbf16>, vector<2x16x32xbf16>, vector<2x16x32xf32> -> vector<2x16x32xf32>
    %cst_39 = arith.constant dense<0.000000e+00> : vector<16x32xf32>
    %120 = vector.multi_reduction <add>, %119, %cst_39 [0] : vector<2x16x32xf32> to vector<16x32xf32>
    %121 = arith.addf %120, %72 : vector<16x32xf32>
    %122 = vector.extract_strided_slice %5 {offsets = [2, 0], sizes = [1, 32], strides = [1, 1]} : vector<8x64xf32> to vector<1x32xf32>
    %123 = vector.extract_strided_slice %5 {offsets = [3, 0], sizes = [1, 32], strides = [1, 1]} : vector<8x64xf32> to vector<1x32xf32>
    %cst_40 = arith.constant dense<0.000000e+00> : vector<16xf32>
    %124 = vector.multi_reduction <add>, %121, %cst_40 [1] : vector<16x32xf32> to vector<16xf32>
    %125 = vector.shape_cast %124 : vector<16xf32> to vector<16x1xf32>
    %cst_41 = arith.constant 3.200000e+01 : f32
    %126 = vector.broadcast %cst_41 : f32 to vector<16x1xf32>
    %127 = arith.divf %125, %126 : vector<16x1xf32>
    %128 = vector.broadcast %127 : vector<16x1xf32> to vector<16x32xf32>
    %129 = arith.subf %121, %128 : vector<16x32xf32>
    %130 = arith.mulf %129, %129 : vector<16x32xf32>
    %cst_42 = arith.constant dense<0.000000e+00> : vector<16xf32>
    %131 = vector.multi_reduction <add>, %130, %cst_42 [1] : vector<16x32xf32> to vector<16xf32>
    %132 = vector.shape_cast %131 : vector<16xf32> to vector<16x1xf32>
    %cst_43 = arith.constant 3.200000e+01 : f32
    %133 = vector.broadcast %cst_43 : f32 to vector<16x1xf32>
    %134 = arith.divf %132, %133 : vector<16x1xf32>
    %cst_44 = arith.constant 9.99999997E-7 : f32
    %135 = vector.broadcast %cst_44 : f32 to vector<16x1xf32>
    %136 = arith.addf %134, %135 : vector<16x1xf32>
    %137 = math.rsqrt %136 : vector<16x1xf32>
    %138 = vector.broadcast %137 : vector<16x1xf32> to vector<16x32xf32>
    %139 = arith.mulf %129, %138 : vector<16x32xf32>
    %140 = vector.broadcast %122 : vector<1x32xf32> to vector<16x32xf32>
    %141 = arith.mulf %139, %140 : vector<16x32xf32>
    %142 = vector.broadcast %123 : vector<1x32xf32> to vector<16x32xf32>
    %143 = arith.addf %141, %142 : vector<16x32xf32>
    %144 = arith.truncf %143 : vector<16x32xf32> to vector<16x32xbf16>
    %c0_45 = arith.constant 0 : index
    %c0_46 = arith.constant 0 : index
    %c0_47 = arith.constant 0 : index
    %145 = vector.load %arg10[%c0_45, %c0_46, %c0_47] : memref<1x32x64xbf16, #tpu.memory_space<vmem>>, vector<1x32x64xbf16>
    %146 = vector.shape_cast %145 : vector<1x32x64xbf16> to vector<32x64xbf16>
    %cst_48 = arith.constant dense<0.000000e+00> : vector<16x64xf32>
    %147 = tpu.matmul %144, %146, %cst_48 {dimension_numbers = #tpu.dot_dimension_numbers<[1], [0], [0], [1], [0, 0, 1, 1], [], []>} : vector<16x32xbf16>, vector<32x64xbf16>, vector<16x64xf32> -> vector<16x64xf32>
    %148 = vector.extract_strided_slice %5 {offsets = [4, 0], sizes = [1, 64], strides = [1, 1]} : vector<8x64xf32> to vector<1x64xf32>
    %149 = vector.broadcast %148 : vector<1x64xf32> to vector<16x64xf32>
    %150 = arith.addf %147, %149 : vector<16x64xf32>
    %cst_49 = arith.constant 0.000000e+00 : f32
    %151 = vector.broadcast %cst_49 : f32 to vector<16x64xf32>
    %152 = arith.maximumf %150, %151 : vector<16x64xf32>
    %153 = arith.truncf %152 : vector<16x64xf32> to vector<16x64xbf16>
    %c0_50 = arith.constant 0 : index
    %c0_51 = arith.constant 0 : index
    %c0_52 = arith.constant 0 : index
    %154 = vector.load %arg11[%c0_50, %c0_51, %c0_52] : memref<1x64x32xbf16, #tpu.memory_space<vmem>>, vector<1x64x32xbf16>
    %155 = vector.shape_cast %154 : vector<1x64x32xbf16> to vector<64x32xbf16>
    %cst_53 = arith.constant dense<0.000000e+00> : vector<16x32xf32>
    %156 = tpu.matmul %153, %155, %cst_53 {dimension_numbers = #tpu.dot_dimension_numbers<[1], [0], [0], [1], [0, 0, 1, 1], [], []>} : vector<16x64xbf16>, vector<64x32xbf16>, vector<16x32xf32> -> vector<16x32xf32>
    %157 = vector.extract_strided_slice %5 {offsets = [5, 0], sizes = [1, 32], strides = [1, 1]} : vector<8x64xf32> to vector<1x32xf32>
    %158 = vector.broadcast %157 : vector<1x32xf32> to vector<16x32xf32>
    %159 = arith.addf %156, %158 : vector<16x32xf32>
    %160 = arith.addf %159, %143 : vector<16x32xf32>
    %161 = vector.extract_strided_slice %5 {offsets = [6, 0], sizes = [1, 32], strides = [1, 1]} : vector<8x64xf32> to vector<1x32xf32>
    %162 = vector.extract_strided_slice %5 {offsets = [7, 0], sizes = [1, 32], strides = [1, 1]} : vector<8x64xf32> to vector<1x32xf32>
    %cst_54 = arith.constant dense<0.000000e+00> : vector<16xf32>
    %163 = vector.multi_reduction <add>, %160, %cst_54 [1] : vector<16x32xf32> to vector<16xf32>
    %164 = vector.shape_cast %163 : vector<16xf32> to vector<16x1xf32>
    %cst_55 = arith.constant 3.200000e+01 : f32
    %165 = vector.broadcast %cst_55 : f32 to vector<16x1xf32>
    %166 = arith.divf %164, %165 : vector<16x1xf32>
    %167 = vector.broadcast %166 : vector<16x1xf32> to vector<16x32xf32>
    %168 = arith.subf %160, %167 : vector<16x32xf32>
    %169 = arith.mulf %168, %168 : vector<16x32xf32>
    %cst_56 = arith.constant dense<0.000000e+00> : vector<16xf32>
    %170 = vector.multi_reduction <add>, %169, %cst_56 [1] : vector<16x32xf32> to vector<16xf32>
    %171 = vector.shape_cast %170 : vector<16xf32> to vector<16x1xf32>
    %cst_57 = arith.constant 3.200000e+01 : f32
    %172 = vector.broadcast %cst_57 : f32 to vector<16x1xf32>
    %173 = arith.divf %171, %172 : vector<16x1xf32>
    %cst_58 = arith.constant 9.99999997E-7 : f32
    %174 = vector.broadcast %cst_58 : f32 to vector<16x1xf32>
    %175 = arith.addf %173, %174 : vector<16x1xf32>
    %176 = math.rsqrt %175 : vector<16x1xf32>
    %177 = vector.broadcast %176 : vector<16x1xf32> to vector<16x32xf32>
    %178 = arith.mulf %168, %177 : vector<16x32xf32>
    %179 = vector.broadcast %161 : vector<1x32xf32> to vector<16x32xf32>
    %180 = arith.mulf %178, %179 : vector<16x32xf32>
    %181 = vector.broadcast %162 : vector<1x32xf32> to vector<16x32xf32>
    %182 = arith.addf %180, %181 : vector<16x32xf32>
    %c0_59 = arith.constant 0 : index
    %c0_60 = arith.constant 0 : index
    %183 = vector.load %arg15[%c0_59, %c0_60] : memref<16x32xf32, #tpu.memory_space<vmem>>, vector<16x32xf32>
    tpu.vector_store %arg15[%c0_59, %c0_60], %182 {strides = array<i32>} : memref<16x32xf32, #tpu.memory_space<vmem>>, vector<16x32xf32>,
    %c1_i32 = arith.constant 1 : i32
    %184 = arith.cmpi eq, %arg0, %c1_i32 : i32
    %185 = arith.extui %184 : i1 to i32
    %c0_i32_61 = arith.constant 0 : i32
    %186 = arith.cmpi ne, %185, %c0_i32_61 : i32
    scf.if %186 {
      %187 = arith.truncf %182 : vector<16x32xf32> to vector<16x32xbf16>
      %c0_62 = arith.constant 0 : index
      %c0_63 = arith.constant 0 : index
      %188 = vector.load %arg13[%c0_62, %c0_63] : memref<32x16xbf16, #tpu.memory_space<vmem>>, vector<32x16xbf16>
      %cst_64 = arith.constant dense<0.000000e+00> : vector<16x16xf32>
      %189 = tpu.matmul %187, %188, %cst_64 {dimension_numbers = #tpu.dot_dimension_numbers<[1], [0], [0], [1], [0, 0, 1, 1], [], []>} : vector<16x32xbf16>, vector<32x16xbf16>, vector<16x16xf32> -> vector<16x16xf32>
      %c0_65 = arith.constant 0 : index
      %c0_66 = arith.constant 0 : index
      %190 = vector.load %arg14[%c0_65, %c0_66] : memref<16x16xf32, #tpu.memory_space<vmem>>, vector<16x16xf32>
      tpu.vector_store %arg14[%c0_65, %c0_66], %189 {strides = array<i32>} : memref<16x16xf32, #tpu.memory_space<vmem>>, vector<16x16xf32>,
    } else {
    }
    return
  }
  func.func @transform_0(%arg0: i32) -> (i32, i32) {
    %c0_i32 = arith.constant 0 : i32
    %c0_i32_0 = arith.constant 0 : i32
    %c0_i32_1 = arith.constant 0 : i32
    return %c0_i32, %c0_i32_0 : i32, i32
  }
  func.func @transform_1(%arg0: i32) -> (i32, i32) {
    %c0_i32 = arith.constant 0 : i32
    %c0_i32_0 = arith.constant 0 : i32
    %c0_i32_1 = arith.constant 0 : i32
    return %c0_i32, %c0_i32_0 : i32, i32
  }
  func.func @transform_2(%arg0: i32) -> (i32, i32) {
    %c0_i32 = arith.constant 0 : i32
    %c0_i32_0 = arith.constant 0 : i32
    %c0_i32_1 = arith.constant 0 : i32
    return %c0_i32, %c0_i32_0 : i32, i32
  }
  func.func @transform_3(%arg0: i32) -> (i32, i32) {
    %c0_i32 = arith.constant 0 : i32
    %c0_i32_0 = arith.constant 0 : i32
    %c0_i32_1 = arith.constant 0 : i32
    return %c0_i32, %c0_i32_0 : i32, i32
  }
  func.func @transform_4(%arg0: i32) -> (i32, i32) {
    %c0_i32 = arith.constant 0 : i32
    %c0_i32_0 = arith.constant 0 : i32
    %c0_i32_1 = arith.constant 0 : i32
    return %c0_i32, %c0_i32_0 : i32, i32
  }
  func.func @transform_5(%arg0: i32) -> (i32, i32, i32) {
    %c0_i32 = arith.constant 0 : i32
    %c0_i32_0 = arith.constant 0 : i32
    %c0_i32_1 = arith.constant 0 : i32
    return %arg0, %c0_i32, %c0_i32_0 : i32, i32, i32
  }
  func.func @transform_6(%arg0: i32) -> (i32, i32, i32, i32) {
    %c0_i32 = arith.constant 0 : i32
    %c0_i32_0 = arith.constant 0 : i32
    %c0_i32_1 = arith.constant 0 : i32
    %c0_i32_2 = arith.constant 0 : i32
    return %arg0, %c0_i32, %c0_i32_0, %c0_i32_1 : i32, i32, i32, i32
  }
  func.func @transform_7(%arg0: i32) -> (i32, i32, i32) {
    %c0_i32 = arith.constant 0 : i32
    %c0_i32_0 = arith.constant 0 : i32
    %c0_i32_1 = arith.constant 0 : i32
    return %arg0, %c0_i32, %c0_i32_0 : i32, i32, i32
  }
  func.func @transform_8(%arg0: i32) -> (i32, i32, i32, i32) {
    %c0_i32 = arith.constant 0 : i32
    %c0_i32_0 = arith.constant 0 : i32
    %c0_i32_1 = arith.constant 0 : i32
    %c0_i32_2 = arith.constant 0 : i32
    return %arg0, %c0_i32, %c0_i32_0, %c0_i32_1 : i32, i32, i32, i32
  }
  func.func @transform_9(%arg0: i32) -> (i32, i32, i32) {
    %c0_i32 = arith.constant 0 : i32
    %c0_i32_0 = arith.constant 0 : i32
    %c0_i32_1 = arith.constant 0 : i32
    return %arg0, %c0_i32, %c0_i32_0 : i32, i32, i32
  }
  func.func @transform_10(%arg0: i32) -> (i32, i32, i32) {
    %c0_i32 = arith.constant 0 : i32
    %c0_i32_0 = arith.constant 0 : i32
    %c0_i32_1 = arith.constant 0 : i32
    return %arg0, %c0_i32, %c0_i32_0 : i32, i32, i32
  }
  func.func @transform_11(%arg0: i32) -> (i32, i32, i32) {
    %c0_i32 = arith.constant 0 : i32
    %c0_i32_0 = arith.constant 0 : i32
    %c0_i32_1 = arith.constant 0 : i32
    return %arg0, %c0_i32, %c0_i32_0 : i32, i32, i32
  }
  func.func @transform_12(%arg0: i32) -> (i32, i32) {
    %c0_i32 = arith.constant 0 : i32
    %c0_i32_0 = arith.constant 0 : i32
    %c0_i32_1 = arith.constant 0 : i32
    return %c0_i32, %c0_i32_0 : i32, i32
  }
  func.func @transform_13(%arg0: i32) -> (i32, i32) {
    %c0_i32 = arith.constant 0 : i32
    %c0_i32_0 = arith.constant 0 : i32
    %c0_i32_1 = arith.constant 0 : i32
    return %c0_i32, %c0_i32_0 : i32, i32
  }
}

</mosaic_0001>

<bundles_post_ra>
// kernel: transformer_forward.2
= control target key start
LH: loop header
LB: loop body
LE: loop exit
PB: predicated region body
PF: predicated region fallthrough
CT: control target
= control target key end

     0   :  { %s1754_s30 = smov 0   ;;  %s1972_s0 = inlined_call_operand.vmem [shape: s32[16,1], index: 0, kind: input, shape index: {}]   ;;  %s1973_s1 = inlined_call_operand.vmem [shape: bf16[16,32], index: 1, kind: input, shape index: {}]   ;;  %s1974_s2 = inlined_call_operand.vmem [shape: f32[8,32], index: 2, kind: input, shape index: {}]   ;;  %s1975_s3 = inlined_call_operand.vmem [shape: f32[2,32], index: 3, kind: input, shape index: {}]   ;;  %s1976_s4 = inlined_call_operand.vmem [shape: bf16[2,32,96], index: 4, kind: input, shape index: {}]   ;;  %s1977_s5 = inlined_call_operand.vmem [shape: bf16[2,2,16,32], index: 5, kind: input, shape index: {}]   ;;  %s1978_s6 = inlined_call_operand.vmem [shape: bf16[2,32,64], index: 6, kind: input, shape index: {}]   ;;  %s1979_s7 = inlined_call_operand.vmem [shape: bf16[2,64,32], index: 7, kind: input, shape index: {}]   ;;  %s1980_s8 = inlined_call_operand.vmem [shape: f32[2,6,64], index: 8, kind: input, shape index: {}]   ;;  %s1981_s9 = inlined_call_operand.vmem [shape: f32[16,32], index: 9, kind: output, shape index: {}]  }
   0x1 LB: > { %s1451_s10 = sadd.s32 4294967295, %s1694_s30   ;;  %p1454_p0 = scmp.ge.s32.totalorder %s1694_s30, 1  ;;  %s1694_s30 = sphi %s1754_s30, %s19_s30  }
   0x2   : > { %p321_p1 = scmp.lt.s32.totalorder %s1694_s30, 3 }
   0x4   : > { %p322_p2 = pnand %p1454_p0, %p321_p1 }
   0x5   : > { %p371_p3 = scmp.lt.s32.totalorder (!%p322_p2), %s1451_s10, 1  ;;  %p1464_p4 = scmp.ne.s32.totalorder (!%p322_p2), %s1451_s10, 0 }
   0x6   : > { %325 = sbr.rel (%p322_p2) target bundleno = 3180 (0xc6c), region = 56 }
   0xd   : > { %s372_s11 = scalar_select %p371_p3, %s1451_s10, 1 }
   0xe   : > { %399 = sbr.rel (%p1464_p4) target bundleno = 684 (0x2ac), region = 60  ;;  %v402_v0 = vld [vmem:[%s1972_s0] sm:$0xff] (!%p1464_p4)  ;;  %v1696_v1 = vmov (!%p1464_p4), 0   ;;  %v1697_v2 = vmov (!%p1464_p4), 0.0   ;;  %v403_v3 = vld [vmem:[%s1972_s0 + $0x8] sm:$0xff] (!%p1464_p4)  ;;  %vm1698_vm0 = vmmov (!%p1464_p4), 0   ;;  %v400_v5 = vlaneseq (!%p1464_p4) }
   0xf   : > { %s1496_s12 = sshll.u32 %s372_s11, 4  ;;  %s1499_s13 = sshll.u32 %s372_s11, 5  ;;  %1643 = vset.pattern.permute.xlu0 (!%p1464_p4), %v1696_v1  ;;  %1533 = vmatprep.subr.bf16.mxu0 (!%p1464_p4), %v1697_v2  ;;  %v1644_v4 = vld [vmem:[%s1973_s1] sm:$0xff] (!%p1464_p4)   ;;  %vm426_vm3 = vcmask (!%p1464_p4), 130048   ;;  %vm473_vm4 = vcmask (!%p1464_p4), 261120  }
  0x10   : > { %s1765_s16 = scalar_lea.vmem %s1976_s4, %s1496_s12  ;;  %s1770_s19 = scalar_lea.vmem %s1977_s5, %s1496_s12  ;;  %405 = vperm.xlu0 (!%p1464_p4), %1643, %v402_v0   ;;  %1534 = vmatpush3.bf16.msra.mxu0 (!%p1464_p4), %v1644_v4  ;;  %v401_v6 = vand.u32 (!%p1464_p4), 127, %v400_v5  ;;  %v419_v12 = vld [vmem:[%s1974_s2] sm:$0xff] (!%p1464_p4) }
  0x11   : > { %s1775_s22 = scalar_lea.vmem %s1978_s6, %s1496_s12  ;;  %s1780_s25 = scalar_lea.vmem %s1979_s7, %s1499_s13  ;;  %1535 = vmatprep.mubr.msk.bf16.mxu0 (!%p1464_p4), %vm1698_vm0, %v1697_v2  ;;  %v1469_v38 = vld [vmem:[%s1975_s3] ss:$0 sm:$0xff] (!%p1464_p4)  ;;  %v1470_v40 = vld [vmem:[%s1975_s3 + $0x1] ss:$0 sm:$0xff] (!%p1464_p4) }
  0x12   : > { %s1463_s26 = sshll.u32 %s372_s11, 3 }
  0x13   : > { %s1785_s29 = scalar_lea.vmem %s1980_s8, %s1463_s26 }
  0x14   : > { %408 = vperm.xlu0 (!%p1464_p4), %1643, %v403_v3  }
  0x8f   : > { %v406_v7 = vpop.permute.xlu0 %405 }
  0x90   : > { %vm410_vm1 = vcmp.eq.s32.totalorder %v406_v7, %v401_v6 }
  0x91   : > { %v1465_v9 = vsel %vm410_vm1, 1.0, %v1697_v2 }
  0x93   : > { %v409_v8 = vpop.permute.xlu0 %408 }
  0x94   : > { %vm411_vm2 = vcmp.eq.s32.totalorder %v409_v8, %v401_v6 }
  0x95   : > { %v1466_v10 = vsel %vm411_vm2, 1.0, %v1697_v2 }
  0x96   : > { %v416_v11 = vpack.c.bf16 %v1466_v10, %v1465_v9 }
  0x98   : > { %1536 = vmatmul.mubr.msk.bf16.vlgmr.msra.gmra.mrb[0].mxu0 %vm426_vm3, %v416_v11 }
 0x16b   : > { %v464_v13 = vpop.f32.mrb[0].mxu0 }
 0x16c   : > { %v465_v14 = vadd.f32 %v464_v13, %v419_v12  ;;  %v1537_v15 = vpop.f32.mrb[1].mxu0 }
 0x16d   : > { %v467_v16 = vpop.f32.mrb[2].mxu0 }
 0x16e   : > { %v468_v17 = vadd.f32 %v467_v16, %v419_v12  ;;  %v1538_v18 = vpop.f32.mrb[3].mxu0  ;;  %v474_v19 = vsel %vm473_vm4, %v465_v14, 0.0 }
 0x16f   : > { %475 = vadd.xlane.f32.xlu1 %v474_v19 }
 0x170   : > { %v477_v20 = vsel %vm473_vm4, %v468_v17, 0.0 }
 0x173   : > { %478 = vadd.xlane.f32.xlu1 %v477_v20 }
 0x1fc   : > { %v476_v21 = vpop.xlane.xlu1 %475 }
 0x1fd   : > { %v481_v22 = vmul.f32 0.03125, %v476_v21 }
 0x1ff   : > { %v483_v23 = vsub.f32 %v465_v14, %v481_v22 }
 0x200   : > { %v479_v24 = vpop.xlane.xlu1 %478 }
 0x201   : > { %v482_v25 = vmul.f32 0.03125, %v479_v24  ;;  %v485_v26 = vmul.f32 %v483_v23, %v483_v23 }
 0x203   : > { %v484_v27 = vsub.f32 %v468_v17, %v482_v25  ;;  %v487_v28 = vsel %vm473_vm4, %v485_v26, 0.0 }
 0x204   : > { %488 = vadd.xlane.f32.xlu0 %v487_v28 }
 0x205   : > { %v486_v29 = vmul.f32 %v484_v27, %v484_v27 }
 0x207   : > { %v490_v30 = vsel %vm473_vm4, %v486_v29, 0.0 }
 0x208   : > { %491 = vadd.xlane.f32.xlu1 %v490_v30 }
 0x291   : > { %v489_v31 = vpop.xlane.xlu0 %488 }
 0x292   : > { %v493_v32 = vmul.f32 0.03125, %v489_v31 }
 0x294   : > { %v495_v33 = vadd.f32 1e-06, %v493_v32 }
 0x295   : > { %v492_v34 = vpop.xlane.xlu1 %491 }
 0x296   : > { %1645 = vrsqrt.f32 %v495_v33  ;;  %v494_v35 = vmul.f32 0.03125, %v492_v34 }
 0x298   : > { %v496_v36 = vadd.f32 1e-06, %v494_v35 }
 0x29a   : > { %1647 = vrsqrt.f32 %v496_v36 }
 0x2a0   : > { %v1646_v37 = vpop.eup %1645 }
 0x2a1   : > { %v499_v39 = vmul.f32 %v1646_v37, %v483_v23 }
 0x2a3   : > { %v505_v41 = vmul.f32 %v1469_v38, %v499_v39 }
 0x2a4   : > { %v1648_v42 = vpop.eup %1647 }
 0x2a5   : > { %v511_v43 = vadd.f32 %v1470_v40, %v505_v41  ;;  %v500_v44 = vmul.f32 %v1648_v42, %v484_v27 }
 0x2a7   : > { %513 = vst.msk [vmem:[%s1981_s9] sm:$0xff] %vm473_vm4, %v511_v43  ;;  %v506_v45 = vmul.f32 %v1469_v38, %v500_v44 }
 0x2a9   : > { %v512_v46 = vadd.f32 %v1470_v40, %v506_v45 }
 0x2ab   : > { %514 = vst.msk [vmem:[%s1981_s9 + $0x8] sm:$0xff] %vm473_vm4, %v512_v46 }
 0x2ac PF: > { %v1654_v47 = vld [vmem:[%s1765_s16] sm:$0xff]   ;;  %v1699_v48 = vmov 0.0   ;;  %v1655_v49 = vld [vmem:[%s1765_s16 + $0x8] sm:$0xff]   ;;  %vm1700_vm5 = vmmov 0   ;;  %vm535_vm6 = vcmask 261120   ;;  %s1701_s16 = smov 112  }
 0x2ad   : > { %1539 = vmatprep.subr.bf16.mxu1 %v1699_v48  ;;  %1553 = vmatprep.subr.bf16.mxu0 %v1699_v48  ;;  %s1702_s17 = smov 96   ;;  %vm599_vm7 = vcmask 130048   ;;  %vm793_vm8 = vcmask 64512   ;;  %s1703_s10 = smov 64   ;;  %vm847_vm9 = vcmask 1043456   ;;  %vm1288_vm10 = vcmask 523264  }
 0x2ae   : > { %1540 = vmatpush3.bf16.msra.mxu1 %v1654_v47  ;;  %1543 = vmatprep.mubr.msk.bf16.mxu1 %vm1700_vm5, %v1699_v48  ;;  %v1826_v50 = vld [vmem:[%s1981_s9] sm:$0xff] }
 0x2af   : > { %1541 = vmatprep.subr.bf16.mxu1 %v1699_v48  ;;  %1555 = vmatprep.mubr.msk.bf16.mxu0 %vm1700_vm5, %v1699_v48 }
 0x2b2   : > { %v1831_v51 = vld [vmem:[%s1981_s9 + $0x8] sm:$0xff]  ;;  %1542 = vmatpush3.bf16.msra.mxu1 %v1655_v49 }
 0x2b3   : > { %v518_v52 = vpack.c.bf16 %v1831_v51, %v1826_v50  ;;  %1547 = vmatprep.subr.bf16.mxu1 %v1699_v48 }
 0x2b5   : > { %1544 = vmatmul.mubr.msk.bf16.vlgmr.msra.gmra.mrb[0].mxu1 %vm535_vm6, %v518_v52 }
 0x2b6   : > { %1549 = vmatprep.mubr.msk.bf16.mxu1 %vm1700_vm5, %v1699_v48 }
 0x388   : > { %v573_v53 = vpop.f32.mrb[0].mxu1 }
 0x389   : > { %v1545_v54 = vpop.f32.mrb[1].mxu1  ;;  %v592_v59 = vpack.c.bf16 %v573_v53, %v573_v53 }
 0x38a   : > { %v576_v55 = vpop.f32.mrb[2].mxu1 }
 0x38b   : > { %v1842_v56 = vpack.c.bf16 %v576_v55, %v576_v55  ;;  %v1546_v57 = vpop.f32.mrb[3].mxu1  ;;  %v1649_v58 = vpack.i.bf16 %v576_v55, %v573_v53 }
 0x38d   : > { %1650 = vrot.lane.b32.xlu0 %v1649_v58, %s1701_s16  ;;  %647 = vrot.lane.b32.xlu1 %v1842_v56, %s1702_s17 }
 0x391   : > { %597 = vrot.lane.b32.xlu0 %v592_v59, %s1702_s17 }
 0x3ff   : > { %v1651_v60 = vpop.permute.xlu0 %1650  ;;  %v648_v61 = vpop.permute.xlu1 %647 }
 0x400   : > { %v1653_v62 = vunpack.i.h.bf16 %v1651_v60  ;;  %v1652_v63 = vunpack.i.l.bf16 %v1651_v60  ;;  %v653_v0 = vsel %vm599_vm7, %v648_v61, 0 }
 0x401   : > { %1554 = vmatpush3.bf16.xpose.msra.mxu0 %v653_v0 }
 0x402   : > { %v1846_v1 = vpack.c.bf16 %v1653_v62, %v1653_v62  ;;  %v1848_v2 = vpack.c.bf16 %v1652_v63, %v1652_v63  ;;  %1565 = vmatprep.subr.bf16.mxu0 %v1699_v48 }
 0x403   : > { %v598_v3 = vpop.permute.xlu0 %597 }
 0x404   : > { %v604_v4 = vsel %vm599_vm7, %v598_v3, 0  ;;  %745 = vrot.lane.b32.xlu0 %v1846_v1, %s1702_s17  ;;  %696 = vrot.lane.b32.xlu1 %v1848_v2, %s1702_s17 }
 0x405   : > { %1548 = vmatpush3.bf16.xpose.msra.mxu1 %v604_v4 }
 0x406   : > { %1559 = vmatprep.subr.bf16.mxu1 %v1699_v48 }
 0x408   : > { %1556 = vmatmul.mubr.msk.bf16.vlgmr.msra.gmra.mrb[0].mxu0 %vm599_vm7, %v1842_v56 }
 0x409   : > { %1567 = vmatprep.mubr.msk.bf16.mxu0 %vm1700_vm5, %v1699_v48 }
 0x40c   : > { %1550 = vmatmul.mubr.msk.bf16.vlgmr.msra.gmra.mrb[4].mxu1 %vm599_vm7, %v592_v59 }
 0x40d   : > { %1561 = vmatprep.mubr.msk.bf16.mxu1 %vm1700_vm5, %v1699_v48 }
 0x476   : > { %v746_v5 = vpop.permute.xlu0 %745  ;;  %v697_v6 = vpop.permute.xlu1 %696 }
 0x477   : > { %v751_v7 = vsel %vm599_vm7, %v746_v5, 0  ;;  %v702_v8 = vsel %vm599_vm7, %v697_v6, 0 }
 0x478   : > { %1560 = vmatpush3.bf16.xpose.msra.mxu1 %v702_v8  ;;  %1566 = vmatpush3.bf16.xpose.msra.mxu0 %v751_v7 }
 0x479   : > { %1571 = vmatprep.subr.bf16.mxu1 %v1699_v48  ;;  %1577 = vmatprep.subr.bf16.mxu0 %v1699_v48 }
 0x47f   : > { %1562 = vmatmul.mubr.msk.bf16.vlgmr.msra.gmra.mrb[8].mxu1 %vm599_vm7, %v1848_v2  ;;  %1568 = vmatmul.mubr.msk.bf16.vlgmr.msra.gmra.mrb[4].mxu0 %vm599_vm7, %v1846_v1 }
 0x480   : > { %1573 = vmatprep.mubr.msk.bf16.mxu1 %vm1700_vm5, %v1699_v48  ;;  %1579 = vmatprep.mubr.msk.bf16.mxu0 %vm1700_vm5, %v1699_v48 }
 0x4db   : > { %v689_v9 = vpop.f32.mrb[0].mxu0 }
 0x4dc   : > { %v1557_v10 = vpop.f32.mrb[1].mxu0  ;;  %v797_v11 = vsel %vm793_vm8, %v689_v9, -inf }
 0x4dd   : > { %798 = vmax.xlane.f32.xlu0 %v797_v11  ;;  %v692_v12 = vpop.f32.mrb[2].mxu0  ;;  %v1657_v10 = vld [vmem:[%s1770_s19 + $0x8] sm:$0xff]  }
 0x4de   : > { %v1558_v13 = vpop.f32.mrb[3].mxu0  ;;  %v1656_v12 = vld [vmem:[%s1770_s19] sm:$0xff]  }
 0x4df   : > { %v640_v14 = vpop.f32.mrb[4].mxu1 }
 0x4e0   : > { %v1551_v15 = vpop.f32.mrb[5].mxu1  ;;  %v794_v16 = vsel %vm793_vm8, %v640_v14, -inf }
 0x4e1   : > { %795 = vmax.xlane.f32.xlu1 %v794_v16  ;;  %v643_v17 = vpop.f32.mrb[6].mxu1 }
 0x4e2   : > { %v1552_v18 = vpop.f32.mrb[7].mxu1 }
 0x552   : > { %v738_v19 = vpop.f32.mrb[8].mxu1  ;;  %v787_v20 = vpop.f32.mrb[4].mxu0 }
 0x553   : > { %v1563_v21 = vpop.f32.mrb[9].mxu1  ;;  %v1569_v22 = vpop.f32.mrb[5].mxu0  ;;  %v803_v23 = vsel %vm793_vm8, %v787_v20, -inf  ;;  %v800_v24 = vsel %vm793_vm8, %v738_v19, -inf }
 0x554   : > { %v790_v25 = vpop.f32.mrb[6].mxu0  ;;  %804 = vmax.xlane.f32.xlu1 %v803_v23  ;;  %801 = vmax.xlane.f32.xlu0 %v800_v24  ;;  %v741_v26 = vpop.f32.mrb[10].mxu1 }
 0x555   : > { %v1564_v27 = vpop.f32.mrb[11].mxu1  ;;  %v1570_v28 = vpop.f32.mrb[7].mxu0 }
 0x565   : > { %891 = vrot.lane.b32.xlu1 %v1842_v56, %s1703_s10 }
 0x56a   : > { %842 = vrot.lane.b32.xlu0 %v592_v59, %s1703_s10  ;;  %v799_v29 = vpop.xlane.xlu0 %798 }
 0x56b   : > { %v807_v31 = vsub.f32 %v689_v9, %v799_v29 }
 0x56d   : > { %v812_v33 = vmul.f32 1.442695, %v807_v31 }
 0x56e   : > { %v796_v30 = vpop.xlane.xlu1 %795 }
 0x56f   : > { %v806_v32 = vsub.f32 %v640_v14, %v796_v30  ;;  %1664 = vpow2.f32 %v812_v33 }
 0x571   : > { %v810_v34 = vmul.f32 1.442695, %v806_v32 }
 0x573   : > { %1666 = vpow2.f32 %v810_v34 }
 0x579   : > { %v1665_v35 = vpop.eup %1664 }
 0x57a   : > { %v821_v37 = vsel %vm793_vm8, %v1665_v35, 0.0 }
 0x57d   : > { %v1667_v36 = vpop.eup %1666 }
 0x57e   : > { %v818_v38 = vsel %vm793_vm8, %v1667_v36, 0.0 }
 0x589   : > { %822 = vadd.xlane.f32.xlu1 %v821_v37  ;;  %819 = vadd.xlane.f32.xlu0 %v818_v38 }
 0x5e1   : > { %v805_v39 = vpop.xlane.xlu1 %804  ;;  %v802_v40 = vpop.xlane.xlu0 %801 }
 0x5e2   : > { %v809_v41 = vsub.f32 %v787_v20, %v805_v39  ;;  %v808_v42 = vsub.f32 %v738_v19, %v802_v40 }
 0x5e4   : > { %v816_v43 = vmul.f32 1.442695, %v809_v41  ;;  %v814_v44 = vmul.f32 1.442695, %v808_v42 }
 0x5e5   : > { %v892_v45 = vpop.permute.xlu1 %891  ;;  %v843_v46 = vpop.permute.xlu0 %842 }
 0x5e6   : > { %1668 = vpow2.f32 %v816_v43  ;;  %v897_v47 = vsel %vm847_vm9, %v892_v45, 0  ;;  %v849_v49 = vsel %vm847_vm9, %v843_v46, 0 }
 0x5e7   : > { %1670 = vpow2.f32 %v814_v44  ;;  %1572 = vmatpush3.bf16.msra.mxu1 %v849_v49  ;;  %1578 = vmatpush3.bf16.msra.mxu0 %v897_v47 }
 0x5e8   : > { %1583 = vmatprep.subr.bf16.mxu1 %v1699_v48  ;;  %1589 = vmatprep.subr.bf16.mxu0 %v1699_v48 }
 0x5f0   : > { %v1669_v52 = vpop.eup %1668 }
 0x5f1   : > { %v1671_v53 = vpop.eup %1670  ;;  %v827_v54 = vsel %vm793_vm8, %v1669_v52, 0.0 }
 0x5f2   : > { %828 = vadd.xlane.f32.xlu1 %v827_v54  ;;  %v824_v55 = vsel %vm793_vm8, %v1671_v53, 0.0 }
 0x5f3   : > { %825 = vadd.xlane.f32.xlu0 %v824_v55 }
 0x603   : > { %939 = vrot.lane.b32.xlu1 %v1848_v2, %s1703_s10 }
 0x609   : > { %987 = vrot.lane.b32.xlu0 %v1846_v1, %s1703_s10 }
 0x616   : > { %v823_v56 = vpop.xlane.xlu1 %822  ;;  %v820_v57 = vpop.xlane.xlu0 %819 }
 0x617   : > { %1672 = vrcp.f32 %v823_v56 }
 0x618   : > { %1674 = vrcp.f32 %v820_v57 }
 0x621   : > { %v1673_v58 = vpop.eup %1672 }
 0x622   : > { %v1675_v59 = vpop.eup %1674  ;;  %v835_v60 = vmul.f32 %v1673_v58, %v1665_v35 }
 0x623   : > { %v834_v61 = vmul.f32 %v1675_v59, %v1667_v36 }
 0x624   : > { %v839_v62 = vpack.c.bf16 %v835_v60, %v835_v60 }
 0x625   : > { %v838_v63 = vpack.c.bf16 %v834_v61, %v834_v61  ;;  %v1658_v61 = vld [vmem:[%s1775_s22] sm:$0xff]  }
 0x626   : > { %1580 = vmatmul.mubr.msk.bf16.vlgmr.msra.gmra.mrb[8].mxu0 %vm793_vm8, %v839_v62  ;;  %v1659_v62 = vld [vmem:[%s1775_s22 + $0x8] sm:$0xff]  }
 0x627   : > { %1574 = vmatmul.mubr.msk.bf16.vlgmr.msra.gmra.mrb[12].mxu1 %vm793_vm8, %v838_v63  ;;  %1591 = vmatprep.mubr.msk.bf16.mxu0 %vm1700_vm5, %v1699_v48  ;;  %v1660_v63 = vld [vmem:[%s1780_s25] sm:$0xff]  }
 0x628   : > { %1585 = vmatprep.mubr.msk.bf16.mxu1 %vm1700_vm5, %v1699_v48 }
 0x67f   : > { %v829_v0 = vpop.xlane.xlu1 %828 }
 0x680   : > { %1676 = vrcp.f32 %v829_v0  ;;  %v826_v1 = vpop.xlane.xlu0 %825  ;;  %v1661_v0 = vld [vmem:[%s1780_s25 + $0x8] sm:$0xff]  }
 0x681   : > { %1678 = vrcp.f32 %v826_v1 }
 0x683   : > { %v940_v2 = vpop.permute.xlu1 %939 }
 0x684   : > { %v945_v3 = vsel %vm847_vm9, %v940_v2, 0  ;;  %v988_v4 = vpop.permute.xlu0 %987 }
 0x685   : > { %v993_v5 = vsel %vm847_vm9, %v988_v4, 0  ;;  %1584 = vmatpush3.bf16.msra.mxu1 %v945_v3  ;;  %v1172_v3 = vlaneseq }
 0x686   : > { %1590 = vmatpush3.bf16.msra.mxu0 %v993_v5  ;;  %1595 = vmatprep.subr.bf16.mxu1 %v1699_v48 }
 0x687   : > { %1601 = vmatprep.subr.bf16.mxu0 %v1699_v48 }
 0x68a   : > { %v1677_v6 = vpop.eup %1676 }
 0x68b   : > { %v1679_v7 = vpop.eup %1678  ;;  %v837_v8 = vmul.f32 %v1677_v6, %v1669_v52 }
 0x68c   : > { %v836_v9 = vmul.f32 %v1679_v7, %v1671_v53 }
 0x68d   : > { %v841_v11 = vpack.c.bf16 %v837_v8, %v837_v8  ;;  %v1936_v8 = vshrl.u32 %v1172_v3, 7 }
 0x68e   : > { %v840_v13 = vpack.c.bf16 %v836_v9, %v836_v9 }
 0x68f   : > { %1592 = vmatmul.mubr.msk.bf16.vlgmr.msra.gmra.mrb[12].mxu0 %vm793_vm8, %v841_v11  ;;  %v1174_v9 = vsub.s32 0, %v1936_v8 }
 0x690   : > { %1586 = vmatmul.mubr.msk.bf16.vlgmr.msra.gmra.mrb[16].mxu1 %vm793_vm8, %v840_v13  ;;  %1602 = vmatpush3.bf16.msra.mxu0 %v1657_v10  ;;  %v1940_v10 = vld [vmem:[%s1785_s29] sm:$0x3f] }
 0x691   : > { %1596 = vmatpush3.bf16.msra.mxu1 %v1656_v12  ;;  %1597 = vmatprep.mubr.msk.bf16.mxu1 %vm1700_vm5, %v1699_v48  ;;  %v1175_v11 = vrot.slane %v1940_v10, %v1174_v9  ;;  %v1180_v12 = vsub.s32 1, %v1936_v8 }
 0x692   : > { %1603 = vmatprep.mubr.msk.bf16.mxu0 %vm1700_vm5, %v1699_v48  ;;  %1607 = vmatprep.subr.bf16.mxu1 %v1699_v48 }
 0x693   : > { %1615 = vmatprep.subr.bf16.mxu0 %v1699_v48 }
 0x6f9   : > { %v933_v14 = vpop.f32.mrb[8].mxu0 }
 0x6fa   : > { %v885_v15 = vpop.f32.mrb[12].mxu1  ;;  %v1581_v16 = vpop.f32.mrb[9].mxu0 }
 0x6fb   : > { %v1035_v17 = vpack.c.bf16 %v933_v14, %v885_v15  ;;  %v1575_v18 = vpop.f32.mrb[13].mxu1  ;;  %v936_v19 = vpop.f32.mrb[10].mxu0 }
 0x6fc   : > { %v888_v20 = vpop.f32.mrb[14].mxu1  ;;  %v1582_v21 = vpop.f32.mrb[11].mxu0  ;;  %v1181_v18 = vrot.slane %v1940_v10, %v1180_v12 }
 0x6fd   : > { %v1576_v22 = vpop.f32.mrb[15].mxu1  ;;  %1598 = vmatmul.mubr.msk.bf16.vlgmr.msra.gmra.mrb[20].mxu1 %vm599_vm7, %v1035_v17 }
 0x6fe   : > { %1611 = vmatprep.mubr.msk.bf16.mxu1 %vm1700_vm5, %v1699_v48  ;;  %1608 = vmatpush3.bf16.msra.mxu1 %v1658_v61 }
 0x6ff   : > { %1609 = vmatprep.subr.bf16.mxu1 %v1699_v48 }
 0x702   : > { %1610 = vmatpush3.bf16.msra.mxu1 %v1659_v62 }
 0x762   : > { %v1029_v23 = vpop.f32.mrb[12].mxu0 }
 0x763   : > { %v981_v24 = vpop.f32.mrb[16].mxu1  ;;  %v1593_v25 = vpop.f32.mrb[13].mxu0 }
 0x764   : > { %v1036_v26 = vpack.c.bf16 %v1029_v23, %v981_v24  ;;  %v1587_v27 = vpop.f32.mrb[17].mxu1  ;;  %v1032_v28 = vpop.f32.mrb[14].mxu0  ;;  %v1662_v23 = vld [vmem:[%s1780_s25 + $0x10] sm:$0xff]   ;;  %v1663_v24 = vld [vmem:[%s1780_s25 + $0x18] sm:$0xff]   ;;  %v1191_v25 = vsub.s32 2, %v1936_v8 }
 0x765   : > { %v984_v29 = vpop.f32.mrb[18].mxu1  ;;  %v1594_v30 = vpop.f32.mrb[15].mxu0 }
 0x766   : > { %v1588_v31 = vpop.f32.mrb[19].mxu1  ;;  %1604 = vmatmul.mubr.msk.bf16.vlgmr.msra.gmra.mrb[16].mxu0 %vm599_vm7, %v1036_v26  ;;  %v1192_v26 = vrot.slane %v1940_v10, %v1191_v25 }
 0x767   : > { %1623 = vmatprep.mubr.msk.bf16.mxu0 %vm1700_vm5, %v1699_v48  ;;  %1616 = vmatpush3.bf16.msra.mxu0 %v1660_v63 }
 0x768   : > { %1617 = vmatprep.subr.bf16.mxu0 %v1699_v48 }
 0x76b   : > { %1618 = vmatpush3.bf16.msra.mxu0 %v1661_v0  ;;  %v1363_v0 = vsub.s32 4, %v1936_v8 }
 0x76c   : > { %1619 = vmatprep.subr.bf16.mxu0 %v1699_v48 }
 0x76f   : > { %1620 = vmatpush3.bf16.msra.mxu0 %v1662_v23 }
 0x770   : > { %1621 = vmatprep.subr.bf16.mxu0 %v1699_v48 }
 0x773   : > { %1622 = vmatpush3.bf16.msra.mxu0 %v1663_v24 }
 0x7d0   : > { %v1080_v32 = vpop.f32.mrb[20].mxu1 }
 0x7d1   : > { %v1599_v33 = vpop.f32.mrb[21].mxu1  ;;  %v1137_v37 = vsel %vm535_vm6, %v1080_v32, 0.0 }
 0x7d2   : > { %v1083_v34 = vpop.f32.mrb[22].mxu1 }
 0x7d3   : > { %v1600_v35 = vpop.f32.mrb[23].mxu1  ;;  %v1140_v42 = vsel %vm535_vm6, %v1083_v34, 0.0 }
 0x839   : > { %v1130_v36 = vpop.f32.mrb[16].mxu0 }
 0x83a   : > { %v1138_v38 = vsel %vm535_vm6, %v1130_v36, 0.0  ;;  %v1605_v39 = vpop.f32.mrb[17].mxu0  ;;  %v1262_v36 = vsub.s32 3, %v1936_v8 }
 0x83b   : > { %v1139_v40 = vadd.f32 %v1138_v38, %v1137_v37  ;;  %v1133_v41 = vpop.f32.mrb[18].mxu0 }
 0x83c   : > { %v1141_v43 = vsel %vm535_vm6, %v1133_v41, 0.0  ;;  %v1606_v44 = vpop.f32.mrb[19].mxu0  ;;  %v1263_v48 = vrot.slane %v1940_v10, %v1262_v36 }
 0x83d   : > { %v1142_v45 = vadd.f32 %v1141_v43, %v1140_v42  ;;  %v1143_v46 = vadd.f32 %v1139_v40, %v1826_v50 }
 0x83f   : > { %v1145_v47 = vsel %vm535_vm6, %v1143_v46, 0.0  ;;  %v1144_v49 = vadd.f32 %v1142_v45, %v1831_v51 }
 0x840   : > { %1146 = vadd.xlane.f32.xlu1 %v1145_v47 }
 0x841   : > { %v1148_v52 = vsel %vm535_vm6, %v1144_v49, 0.0 }
 0x842   : > { %1149 = vadd.xlane.f32.xlu0 %v1148_v52 }
 0x8cd   : > { %v1147_v53 = vpop.xlane.xlu1 %1146 }
 0x8ce   : > { %v1152_v54 = vmul.f32 0.03125, %v1147_v53 }
 0x8cf   : > { %v1150_v55 = vpop.xlane.xlu0 %1149 }
 0x8d0   : > { %v1154_v56 = vsub.f32 %v1143_v46, %v1152_v54  ;;  %v1153_v57 = vmul.f32 0.03125, %v1150_v55 }
 0x8d2   : > { %v1155_v58 = vsub.f32 %v1144_v49, %v1153_v57  ;;  %v1156_v59 = vmul.f32 %v1154_v56, %v1154_v56 }
 0x8d4   : > { %v1158_v50 = vsel %vm535_vm6, %v1156_v59, 0.0  ;;  %v1157_v60 = vmul.f32 %v1155_v58, %v1155_v58 }
 0x8d5   : > { %1159 = vadd.xlane.f32.xlu0 %v1158_v50 }
 0x8d6   : > { %v1161_v51 = vsel %vm535_vm6, %v1157_v60, 0.0 }
 0x8d7   : > { %1162 = vadd.xlane.f32.xlu1 %v1161_v51 }
 0x962   : > { %v1160_v1 = vpop.xlane.xlu0 %1159 }
 0x963   : > { %v1164_v2 = vmul.f32 0.03125, %v1160_v1  ;;  %v1369_v1 = vsub.s32 5, %v1936_v8 }
 0x964   : > { %v1163_v4 = vpop.xlane.xlu1 %1162 }
 0x965   : > { %v1166_v5 = vadd.f32 1e-06, %v1164_v2  ;;  %v1165_v6 = vmul.f32 0.03125, %v1163_v4  ;;  %v1364_v2 = vrot.slane %v1940_v10, %v1363_v0  ;;  %v1370_v4 = vrot.slane %v1940_v10, %v1369_v1 }
 0x967   : > { %1680 = vrsqrt.f32 %v1166_v5  ;;  %v1167_v7 = vadd.f32 1e-06, %v1165_v6 }
 0x969   : > { %1682 = vrsqrt.f32 %v1167_v7 }
 0x971   : > { %v1681_v13 = vpop.eup %1680 }
 0x972   : > { %v1170_v14 = vmul.f32 %v1681_v13, %v1154_v56 }
 0x973   : > { %v1683_v15 = vpop.eup %1682 }
 0x974   : > { %v1176_v16 = vmul.f32 %v1175_v11, %v1170_v14  ;;  %v1171_v17 = vmul.f32 %v1683_v15, %v1155_v58 }
 0x976   : > { %v1177_v19 = vmul.f32 %v1175_v11, %v1171_v17  ;;  %v1182_v20 = vadd.f32 %v1181_v18, %v1176_v16 }
 0x978   : > { %v1183_v21 = vadd.f32 %v1181_v18, %v1177_v19 }
 0x97a   : > { %v1184_v22 = vpack.c.bf16 %v1183_v21, %v1182_v20 }
 0x97c   : > { %1612 = vmatmul.mubr.msk.bf16.vlgmr.msra.gmra.mrb[24].mxu1 %vm535_vm6, %v1184_v22 }
 0xa4f   : > { %v1242_v27 = vpop.f32.mrb[24].mxu1 }
 0xa50   : > { %v1243_v28 = vadd.f32 %v1242_v27, %v1192_v26  ;;  %v1613_v29 = vpop.f32.mrb[25].mxu1 }
 0xa51   : > { %v1245_v30 = vpop.f32.mrb[26].mxu1 }
 0xa52   : > { %v1246_v31 = vadd.f32 %v1245_v30, %v1192_v26  ;;  %v1614_v32 = vpop.f32.mrb[27].mxu1  ;;  %v1249_v33 = vmax.f32 %v1243_v28, 0.0 }
 0xa54   : > { %v1250_v34 = vmax.f32 %v1246_v31, 0.0 }
 0xa56   : > { %v1251_v35 = vpack.c.bf16 %v1250_v34, %v1249_v33 }
 0xa58   : > { %1624 = vmatmul.mubr.msk.bf16.vlgmr.msra.gmra.mrb[20].mxu0 %vm1288_vm10, %v1251_v35 }
 0xb2b   : > { %v1326_v37 = vpop.f32.mrb[20].mxu0 }
 0xb2c   : > { %v1327_v38 = vadd.f32 %v1326_v37, %v1263_v48  ;;  %v1625_v39 = vpop.f32.mrb[21].mxu0 }
 0xb2d   : > { %v1329_v40 = vpop.f32.mrb[22].mxu0 }
 0xb2e   : > { %v1330_v41 = vadd.f32 %v1329_v40, %v1263_v48  ;;  %v1626_v42 = vpop.f32.mrb[23].mxu0  ;;  %v1333_v43 = vadd.f32 %v1327_v38, %v1182_v20 }
 0xb30   : > { %v1335_v44 = vsel %vm535_vm6, %v1333_v43, 0.0  ;;  %v1334_v45 = vadd.f32 %v1330_v41, %v1183_v21 }
 0xb31   : > { %1336 = vadd.xlane.f32.xlu0 %v1335_v44 }
 0xb32   : > { %v1338_v46 = vsel %vm535_vm6, %v1334_v45, 0.0 }
 0xb33   : > { %1339 = vadd.xlane.f32.xlu1 %v1338_v46 }
 0xbbe   : > { %v1337_v47 = vpop.xlane.xlu0 %1336 }
 0xbbf   : > { %v1341_v49 = vmul.f32 0.03125, %v1337_v47 }
 0xbc0   : > { %v1340_v52 = vpop.xlane.xlu1 %1339 }
 0xbc1   : > { %v1343_v53 = vsub.f32 %v1333_v43, %v1341_v49  ;;  %v1342_v54 = vmul.f32 0.03125, %v1340_v52 }
 0xbc3   : > { %v1344_v55 = vsub.f32 %v1334_v45, %v1342_v54  ;;  %v1345_v56 = vmul.f32 %v1343_v53, %v1343_v53 }
 0xbc5   : > { %v1347_v57 = vsel %vm535_vm6, %v1345_v56, 0.0  ;;  %v1346_v58 = vmul.f32 %v1344_v55, %v1344_v55 }
 0xbc6   : > { %1348 = vadd.xlane.f32.xlu0 %v1347_v57 }
 0xbc7   : > { %v1350_v59 = vsel %vm535_vm6, %v1346_v58, 0.0 }
 0xbc8   : > { %1351 = vadd.xlane.f32.xlu1 %v1350_v59 }
 0xc53   : > { %v1349_v50 = vpop.xlane.xlu0 %1348 }
 0xc54   : > { %v1353_v60 = vmul.f32 0.03125, %v1349_v50 }
 0xc55   : > { %v1352_v51 = vpop.xlane.xlu1 %1351 }
 0xc56   : > { %v1355_v61 = vadd.f32 1e-06, %v1353_v60  ;;  %v1354_v62 = vmul.f32 0.03125, %v1352_v51 }
 0xc58   : > { %1684 = vrsqrt.f32 %v1355_v61  ;;  %v1356_v63 = vadd.f32 1e-06, %v1354_v62 }
 0xc5a   : > { %1686 = vrsqrt.f32 %v1356_v63 }
 0xc62   : > { %v1685_v3 = vpop.eup %1684 }
 0xc63   : > { %v1359_v5 = vmul.f32 %v1685_v3, %v1343_v53 }
 0xc64   : > { %v1687_v6 = vpop.eup %1686 }
 0xc65   : > { %v1365_v7 = vmul.f32 %v1364_v2, %v1359_v5  ;;  %v1360_v9 = vmul.f32 %v1687_v6, %v1344_v55 }
 0xc67   : > { %v1371_v11 = vadd.f32 %v1370_v4, %v1365_v7  ;;  %v1366_v12 = vmul.f32 %v1364_v2, %v1360_v9 }
 0xc69   : > { %1373 = vst.msk [vmem:[%s1981_s9] sm:$0xff] %vm535_vm6, %v1371_v11  ;;  %v1372_v13 = vadd.f32 %v1370_v4, %v1366_v12 }
 0xc6b   : > { %1374 = vst.msk [vmem:[%s1981_s9 + $0x8] sm:$0xff] %vm535_vm6, %v1372_v13 }
 0xc6c PF: > { %s19_s30 = sadd.s32 1, %s1694_s30  }
 0xc6d   : > { %p16_p5 = scmp.ge.s32.totalorder %s19_s30, 4  }
 0xc6f   :  { %18 = sbr.rel (!%p16_p5) target bundleno = 1 (0x1), region = 98 }

// kernel: transformer_forward.3
= control target key start
LH: loop header
LB: loop body
LE: loop exit
PB: predicated region body
PF: predicated region fallthrough
CT: control target
= control target key end

     0   :  { %s3348_s0 = inlined_call_operand.vmem [shape: s32[16,1], index: 0, kind: input, shape index: {}]   ;;  %s3349_s1 = inlined_call_operand.vmem [shape: bf16[16,32], index: 1, kind: input, shape index: {}]   ;;  %s3350_s2 = inlined_call_operand.vmem [shape: f32[8,32], index: 2, kind: input, shape index: {}]   ;;  %s3351_s3 = inlined_call_operand.vmem [shape: f32[2,32], index: 3, kind: input, shape index: {}]   ;;  %s3352_s4 = inlined_call_operand.vmem [shape: f32[16,32], index: 4, kind: input, shape index: {}]   ;;  %s3353_s5 = inlined_call_operand.vmem [shape: bf16[2,32,96], index: 5, kind: input, shape index: {}]   ;;  %s3354_s6 = inlined_call_operand.vmem [shape: bf16[2,2,16,32], index: 6, kind: input, shape index: {}]   ;;  %s3355_s7 = inlined_call_operand.vmem [shape: bf16[2,32,96], index: 7, kind: input, shape index: {}]   ;;  %s3356_s8 = inlined_call_operand.vmem [shape: bf16[2,2,16,32], index: 8, kind: input, shape index: {}]   ;;  %s3357_s9 = inlined_call_operand.vmem [shape: bf16[2,32,64], index: 9, kind: input, shape index: {}]   ;;  %s3358_s10 = inlined_call_operand.vmem [shape: bf16[2,64,32], index: 10, kind: input, shape index: {}]   ;;  %s3359_s11 = inlined_call_operand.vmem [shape: f32[2,8,64], index: 11, kind: input, shape index: {}]   ;;  %s3360_s12 = inlined_call_operand.vmem [shape: bf16[32,16], index: 12, kind: input, shape index: {}]   ;;  %s3361_s13 = inlined_call_operand.hbm [shape: f32[16,16], index: 13, kind: output, shape index: {}]  }
   0x1   :  { %3364 = sst [smem:[#allocation7_spill]] %s3353_s5 }
   0x2   :  { %3365 = sst [smem:[#allocation8_spill]] %s3354_s6 }
   0x3   :  { %3366 = sst [smem:[#allocation9_spill]] %s3361_s13 }
   0x4   :  { %18 = vsyncpa [#allocation4], 0  ;;  %s2975_s25 = smov 0  }
   0x5 LB: > { %3367 = sst [smem:[#allocation6_spill]] %s2890_s25  ;;  %s2981_s26 = sadd.s32 4294967295, %s2890_s25   ;;  %s2890_s25 = sphi %s2975_s25, %s24_s25  }
   0x6   : > { %p2432_p0 = scmp.ge.s32.totalorder %s2890_s25, 1  ;;  %p442_p1 = scmp.lt.s32.totalorder %s2890_s25, 3 }
   0x8   : > { %p443_p2 = pnand %p2432_p0, %p442_p1 }
   0x9   : > { %p510_p3 = scmp.lt.s32.totalorder (!%p443_p2), %s2981_s26, 1  ;;  %s3368_s5 = sld [smem:[#allocation7_spill]] (!%p443_p2) }
   0xa   : > { %446 = sbr.rel (%p443_p2) target bundleno = 5044 (0x13b4), region = 72  ;;  %s3369_s6 = sld [smem:[#allocation8_spill]] (!%p443_p2) }
   0xb   : > { %p2446_p4 = scmp.ne.s32.totalorder (!%p443_p2), %s2981_s26, 0 }
  0x11   : > { %s511_s27 = scalar_select %p510_p3, %s2981_s26, 1 }
  0x12   : > { %548 = sbr.rel (%p2446_p4) target bundleno = 688 (0x2b0), region = 76  ;;  %v551_v0 = vld [vmem:[%s3348_s0] sm:$0xff] (!%p2446_p4)  ;;  %v2892_v1 = vmov (!%p2446_p4), 0   ;;  %v2893_v2 = vmov (!%p2446_p4), 0.0   ;;  %v552_v3 = vld [vmem:[%s3348_s0 + $0x8] sm:$0xff] (!%p2446_p4)  ;;  %vm2894_vm0 = vmmov (!%p2446_p4), 0   ;;  %v549_v5 = vlaneseq (!%p2446_p4) }
  0x13   : > { %s2500_s28 = sshll.u32 %s511_s27, 4  ;;  %s2505_s29 = sshll.u32 %s511_s27, 5  ;;  %2773 = vset.pattern.permute.xlu0 (!%p2446_p4), %v2892_v1  ;;  %2568 = vmatprep.subr.bf16.mxu0 (!%p2446_p4), %v2893_v2  ;;  %v2774_v4 = vld [vmem:[%s3349_s1] sm:$0xff] (!%p2446_p4)   ;;  %vm575_vm3 = vcmask (!%p2446_p4), 130048   ;;  %vm622_vm4 = vcmask (!%p2446_p4), 261120  }
  0x14   : > { %s2990_s15 = scalar_lea.vmem %s3368_s5, %s2500_s28  ;;  %s2995_s18 = scalar_lea.vmem %s3369_s6, %s2500_s28  ;;  %554 = vperm.xlu0 (!%p2446_p4), %2773, %v551_v0   ;;  %2569 = vmatpush3.bf16.msra.mxu0 (!%p2446_p4), %v2774_v4  ;;  %v550_v6 = vand.u32 (!%p2446_p4), 127, %v549_v5  ;;  %v568_v12 = vld [vmem:[%s3350_s2] sm:$0xff] (!%p2446_p4) }
  0x15   : > { %s3000_s21 = scalar_lea.vmem %s3355_s7, %s2500_s28  ;;  %s3005_s24 = scalar_lea.vmem %s3356_s8, %s2500_s28  ;;  %2570 = vmatprep.mubr.msk.bf16.mxu0 (!%p2446_p4), %vm2894_vm0, %v2893_v2  ;;  %v2451_v38 = vld [vmem:[%s3351_s3] ss:$0 sm:$0xff] (!%p2446_p4)  ;;  %v2452_v40 = vld [vmem:[%s3351_s3 + $0x1] ss:$0 sm:$0xff] (!%p2446_p4) }
  0x16   : > { %s3010_s30 = scalar_lea.vmem %s3357_s9, %s2500_s28  ;;  %s3015_s16 = scalar_lea.vmem %s3358_s10, %s2505_s29 }
  0x17   : > { %s2445_s17 = sshll.u32 %s511_s27, 3 }
  0x18   : > { %s3020_s20 = scalar_lea.vmem %s3359_s11, %s2445_s17  ;;  %557 = vperm.xlu0 (!%p2446_p4), %2773, %v552_v3  }
  0x93   : > { %v555_v7 = vpop.permute.xlu0 %554 }
  0x94   : > { %vm559_vm1 = vcmp.eq.s32.totalorder %v555_v7, %v550_v6 }
  0x95   : > { %v2447_v9 = vsel %vm559_vm1, 1.0, %v2893_v2 }
  0x97   : > { %v558_v8 = vpop.permute.xlu0 %557 }
  0x98   : > { %vm560_vm2 = vcmp.eq.s32.totalorder %v558_v8, %v550_v6 }
  0x99   : > { %v2448_v10 = vsel %vm560_vm2, 1.0, %v2893_v2 }
  0x9a   : > { %v565_v11 = vpack.c.bf16 %v2448_v10, %v2447_v9 }
  0x9c   : > { %2571 = vmatmul.mubr.msk.bf16.vlgmr.msra.gmra.mrb[0].mxu0 %vm575_vm3, %v565_v11 }
 0x16f   : > { %v613_v13 = vpop.f32.mrb[0].mxu0 }
 0x170   : > { %v614_v14 = vadd.f32 %v613_v13, %v568_v12  ;;  %v2572_v15 = vpop.f32.mrb[1].mxu0 }
 0x171   : > { %v616_v16 = vpop.f32.mrb[2].mxu0 }
 0x172   : > { %v617_v17 = vadd.f32 %v616_v16, %v568_v12  ;;  %v2573_v18 = vpop.f32.mrb[3].mxu0  ;;  %v623_v19 = vsel %vm622_vm4, %v614_v14, 0.0 }
 0x173   : > { %624 = vadd.xlane.f32.xlu1 %v623_v19 }
 0x174   : > { %v626_v20 = vsel %vm622_vm4, %v617_v17, 0.0 }
 0x177   : > { %627 = vadd.xlane.f32.xlu1 %v626_v20 }
 0x200   : > { %v625_v21 = vpop.xlane.xlu1 %624 }
 0x201   : > { %v630_v22 = vmul.f32 0.03125, %v625_v21 }
 0x203   : > { %v632_v23 = vsub.f32 %v614_v14, %v630_v22 }
 0x204   : > { %v628_v24 = vpop.xlane.xlu1 %627 }
 0x205   : > { %v631_v25 = vmul.f32 0.03125, %v628_v24  ;;  %v634_v26 = vmul.f32 %v632_v23, %v632_v23 }
 0x207   : > { %v633_v27 = vsub.f32 %v617_v17, %v631_v25  ;;  %v636_v28 = vsel %vm622_vm4, %v634_v26, 0.0 }
 0x208   : > { %637 = vadd.xlane.f32.xlu0 %v636_v28 }
 0x209   : > { %v635_v29 = vmul.f32 %v633_v27, %v633_v27 }
 0x20b   : > { %v639_v30 = vsel %vm622_vm4, %v635_v29, 0.0 }
 0x20c   : > { %640 = vadd.xlane.f32.xlu1 %v639_v30 }
 0x295   : > { %v638_v31 = vpop.xlane.xlu0 %637 }
 0x296   : > { %v642_v32 = vmul.f32 0.03125, %v638_v31 }
 0x298   : > { %v644_v33 = vadd.f32 1e-06, %v642_v32 }
 0x299   : > { %v641_v34 = vpop.xlane.xlu1 %640 }
 0x29a   : > { %2775 = vrsqrt.f32 %v644_v33  ;;  %v643_v35 = vmul.f32 0.03125, %v641_v34 }
 0x29c   : > { %v645_v36 = vadd.f32 1e-06, %v643_v35 }
 0x29e   : > { %2777 = vrsqrt.f32 %v645_v36 }
 0x2a4   : > { %v2776_v37 = vpop.eup %2775 }
 0x2a5   : > { %v648_v39 = vmul.f32 %v2776_v37, %v632_v23 }
 0x2a7   : > { %v654_v41 = vmul.f32 %v2451_v38, %v648_v39 }
 0x2a8   : > { %v2778_v42 = vpop.eup %2777 }
 0x2a9   : > { %v660_v43 = vadd.f32 %v2452_v40, %v654_v41  ;;  %v649_v44 = vmul.f32 %v2778_v42, %v633_v27 }
 0x2ab   : > { %662 = vst.msk [vmem:[#allocation2] sm:$0xff] %vm622_vm4, %v660_v43  ;;  %v655_v45 = vmul.f32 %v2451_v38, %v649_v44 }
 0x2ad   : > { %v661_v46 = vadd.f32 %v2452_v40, %v655_v45 }
 0x2af   : > { %663 = vst.msk [vmem:[#allocation2 + $0x8] sm:$0xff] %vm622_vm4, %v661_v46 }
 0x2b0 PF: > { %v2794_v47 = vld [vmem:[%s2990_s15] sm:$0xff]   ;;  %v2895_v48 = vmov 0.0   ;;  %v2795_v49 = vld [vmem:[%s2990_s15 + $0x8] sm:$0xff]   ;;  %vm2896_vm5 = vmmov 0   ;;  %vm684_vm6 = vcmask 261120   ;;  %s2897_s15 = smov 112  }
 0x2b1   : > { %2574 = vmatprep.subr.bf16.mxu1 %v2895_v48  ;;  %2588 = vmatprep.subr.bf16.mxu0 %v2895_v48  ;;  %s2898_s22 = smov 96   ;;  %vm748_vm7 = vcmask 130048   ;;  %vm942_vm8 = vcmask 64512   ;;  %s2899_s23 = smov 64   ;;  %vm996_vm9 = vcmask 1043456   ;;  %vm2155_vm10 = vcmask 523264  }
 0x2b2   : > { %2575 = vmatpush3.bf16.msra.mxu1 %v2794_v47  ;;  %2578 = vmatprep.mubr.msk.bf16.mxu1 %vm2896_vm5, %v2895_v48  ;;  %v3053_v50 = vld [vmem:[#allocation2] sm:$0xff]  ;;  %p2492_p5 = scmp.ne.s32.totalorder %s2981_s26, 1 }
 0x2b3   : > { %2576 = vmatprep.subr.bf16.mxu1 %v2895_v48  ;;  %2590 = vmatprep.mubr.msk.bf16.mxu0 %vm2896_vm5, %v2895_v48  ;;  %vm2901_vm11 = vmmov (!%p2492_p5), 0  }
 0x2b6   : > { %v3055_v51 = vld [vmem:[#allocation2 + $0x8] sm:$0xff]  ;;  %2577 = vmatpush3.bf16.msra.mxu1 %v2795_v49 }
 0x2b7   : > { %v667_v52 = vpack.c.bf16 %v3055_v51, %v3053_v50  ;;  %2582 = vmatprep.subr.bf16.mxu1 %v2895_v48 }
 0x2b9   : > { %2579 = vmatmul.mubr.msk.bf16.vlgmr.msra.gmra.mrb[0].mxu1 %vm684_vm6, %v667_v52 }
 0x2ba   : > { %2584 = vmatprep.mubr.msk.bf16.mxu1 %vm2896_vm5, %v2895_v48 }
 0x38c   : > { %v722_v53 = vpop.f32.mrb[0].mxu1 }
 0x38d   : > { %v2580_v54 = vpop.f32.mrb[1].mxu1  ;;  %v741_v59 = vpack.c.bf16 %v722_v53, %v722_v53 }
 0x38e   : > { %v725_v55 = vpop.f32.mrb[2].mxu1 }
 0x38f   : > { %v3066_v56 = vpack.c.bf16 %v725_v55, %v725_v55  ;;  %v2581_v57 = vpop.f32.mrb[3].mxu1  ;;  %v2779_v58 = vpack.i.bf16 %v725_v55, %v722_v53 }
 0x391   : > { %2780 = vrot.lane.b32.xlu0 %v2779_v58, %s2897_s15  ;;  %796 = vrot.lane.b32.xlu1 %v3066_v56, %s2898_s22 }
 0x395   : > { %746 = vrot.lane.b32.xlu0 %v741_v59, %s2898_s22 }
 0x403   : > { %v2781_v60 = vpop.permute.xlu0 %2780  ;;  %v797_v61 = vpop.permute.xlu1 %796 }
 0x404   : > { %v2783_v62 = vunpack.i.h.bf16 %v2781_v60  ;;  %v2782_v63 = vunpack.i.l.bf16 %v2781_v60  ;;  %v802_v0 = vsel %vm748_vm7, %v797_v61, 0 }
 0x405   : > { %2589 = vmatpush3.bf16.xpose.msra.mxu0 %v802_v0 }
 0x406   : > { %v3073_v1 = vpack.c.bf16 %v2783_v62, %v2783_v62  ;;  %v3075_v2 = vpack.c.bf16 %v2782_v63, %v2782_v63  ;;  %2600 = vmatprep.subr.bf16.mxu0 %v2895_v48 }
 0x407   : > { %v747_v3 = vpop.permute.xlu0 %746 }
 0x408   : > { %v753_v4 = vsel %vm748_vm7, %v747_v3, 0  ;;  %894 = vrot.lane.b32.xlu0 %v3073_v1, %s2898_s22  ;;  %845 = vrot.lane.b32.xlu1 %v3075_v2, %s2898_s22 }
 0x409   : > { %2583 = vmatpush3.bf16.xpose.msra.mxu1 %v753_v4 }
 0x40a   : > { %2594 = vmatprep.subr.bf16.mxu1 %v2895_v48 }
 0x40c   : > { %2591 = vmatmul.mubr.msk.bf16.vlgmr.msra.gmra.mrb[0].mxu0 %vm748_vm7, %v3066_v56 }
 0x40d   : > { %2602 = vmatprep.mubr.msk.bf16.mxu0 %vm2896_vm5, %v2895_v48 }
 0x410   : > { %2585 = vmatmul.mubr.msk.bf16.vlgmr.msra.gmra.mrb[4].mxu1 %vm748_vm7, %v741_v59 }
 0x411   : > { %2596 = vmatprep.mubr.msk.bf16.mxu1 %vm2896_vm5, %v2895_v48 }
 0x47a   : > { %v895_v5 = vpop.permute.xlu0 %894  ;;  %v846_v6 = vpop.permute.xlu1 %845 }
 0x47b   : > { %v900_v7 = vsel %vm748_vm7, %v895_v5, 0  ;;  %v851_v8 = vsel %vm748_vm7, %v846_v6, 0 }
 0x47c   : > { %2595 = vmatpush3.bf16.xpose.msra.mxu1 %v851_v8  ;;  %2601 = vmatpush3.bf16.xpose.msra.mxu0 %v900_v7 }
 0x47d   : > { %2606 = vmatprep.subr.bf16.mxu1 %v2895_v48  ;;  %2612 = vmatprep.subr.bf16.mxu0 %v2895_v48 }
 0x483   : > { %2597 = vmatmul.mubr.msk.bf16.vlgmr.msra.gmra.mrb[8].mxu1 %vm748_vm7, %v3075_v2  ;;  %2603 = vmatmul.mubr.msk.bf16.vlgmr.msra.gmra.mrb[4].mxu0 %vm748_vm7, %v3073_v1 }
 0x484   : > { %2608 = vmatprep.mubr.msk.bf16.mxu1 %vm2896_vm5, %v2895_v48  ;;  %2614 = vmatprep.mubr.msk.bf16.mxu0 %vm2896_vm5, %v2895_v48 }
 0x4df   : > { %v838_v9 = vpop.f32.mrb[0].mxu0 }
 0x4e0   : > { %v2592_v10 = vpop.f32.mrb[1].mxu0  ;;  %v946_v11 = vsel %vm942_vm8, %v838_v9, -inf }
 0x4e1   : > { %947 = vmax.xlane.f32.xlu0 %v946_v11  ;;  %v841_v12 = vpop.f32.mrb[2].mxu0  ;;  %v2797_v10 = vld [vmem:[%s2995_s18 + $0x8] sm:$0xff]  }
 0x4e2   : > { %v2593_v13 = vpop.f32.mrb[3].mxu0  ;;  %v2796_v12 = vld [vmem:[%s2995_s18] sm:$0xff]  }
 0x4e3   : > { %v789_v14 = vpop.f32.mrb[4].mxu1 }
 0x4e4   : > { %v2586_v15 = vpop.f32.mrb[5].mxu1  ;;  %v943_v16 = vsel %vm942_vm8, %v789_v14, -inf }
 0x4e5   : > { %944 = vmax.xlane.f32.xlu1 %v943_v16  ;;  %v792_v17 = vpop.f32.mrb[6].mxu1 }
 0x4e6   : > { %v2587_v18 = vpop.f32.mrb[7].mxu1 }
 0x556   : > { %v887_v19 = vpop.f32.mrb[8].mxu1  ;;  %v936_v20 = vpop.f32.mrb[4].mxu0 }
 0x557   : > { %v2598_v21 = vpop.f32.mrb[9].mxu1  ;;  %v2604_v22 = vpop.f32.mrb[5].mxu0  ;;  %v952_v23 = vsel %vm942_vm8, %v936_v20, -inf  ;;  %v949_v24 = vsel %vm942_vm8, %v887_v19, -inf }
 0x558   : > { %v939_v25 = vpop.f32.mrb[6].mxu0  ;;  %953 = vmax.xlane.f32.xlu1 %v952_v23  ;;  %950 = vmax.xlane.f32.xlu0 %v949_v24  ;;  %v890_v26 = vpop.f32.mrb[10].mxu1 }
 0x559   : > { %v2599_v27 = vpop.f32.mrb[11].mxu1  ;;  %v2605_v28 = vpop.f32.mrb[7].mxu0 }
 0x569   : > { %1040 = vrot.lane.b32.xlu1 %v3066_v56, %s2899_s23 }
 0x56e   : > { %991 = vrot.lane.b32.xlu0 %v741_v59, %s2899_s23  ;;  %v948_v29 = vpop.xlane.xlu0 %947 }
 0x56f   : > { %v956_v31 = vsub.f32 %v838_v9, %v948_v29 }
 0x571   : > { %v961_v33 = vmul.f32 1.442695, %v956_v31 }
 0x572   : > { %v945_v30 = vpop.xlane.xlu1 %944 }
 0x573   : > { %v955_v32 = vsub.f32 %v789_v14, %v945_v30  ;;  %2808 = vpow2.f32 %v961_v33 }
 0x575   : > { %v959_v34 = vmul.f32 1.442695, %v955_v32 }
 0x577   : > { %2810 = vpow2.f32 %v959_v34 }
 0x57d   : > { %v2809_v35 = vpop.eup %2808 }
 0x57e   : > { %v970_v37 = vsel %vm942_vm8, %v2809_v35, 0.0 }
 0x581   : > { %v2811_v36 = vpop.eup %2810 }
 0x582   : > { %v967_v38 = vsel %vm942_vm8, %v2811_v36, 0.0 }
 0x58d   : > { %971 = vadd.xlane.f32.xlu1 %v970_v37  ;;  %968 = vadd.xlane.f32.xlu0 %v967_v38 }
 0x5e5   : > { %v954_v39 = vpop.xlane.xlu1 %953  ;;  %v951_v40 = vpop.xlane.xlu0 %950 }
 0x5e6   : > { %v958_v41 = vsub.f32 %v936_v20, %v954_v39  ;;  %v957_v42 = vsub.f32 %v887_v19, %v951_v40 }
 0x5e8   : > { %v965_v43 = vmul.f32 1.442695, %v958_v41  ;;  %v963_v44 = vmul.f32 1.442695, %v957_v42 }
 0x5e9   : > { %v1041_v45 = vpop.permute.xlu1 %1040  ;;  %v992_v46 = vpop.permute.xlu0 %991 }
 0x5ea   : > { %2812 = vpow2.f32 %v965_v43  ;;  %v1046_v47 = vsel %vm996_vm9, %v1041_v45, 0  ;;  %v998_v49 = vsel %vm996_vm9, %v992_v46, 0 }
 0x5eb   : > { %2814 = vpow2.f32 %v963_v44  ;;  %2607 = vmatpush3.bf16.msra.mxu1 %v998_v49  ;;  %2613 = vmatpush3.bf16.msra.mxu0 %v1046_v47 }
 0x5ec   : > { %2618 = vmatprep.subr.bf16.mxu1 %v2895_v48  ;;  %2624 = vmatprep.subr.bf16.mxu0 %v2895_v48 }
 0x5f4   : > { %v2813_v52 = vpop.eup %2812 }
 0x5f5   : > { %v2815_v53 = vpop.eup %2814  ;;  %v976_v54 = vsel %vm942_vm8, %v2813_v52, 0.0 }
 0x5f6   : > { %977 = vadd.xlane.f32.xlu1 %v976_v54  ;;  %v973_v55 = vsel %vm942_vm8, %v2815_v53, 0.0  ;;  %v2799_v54 = vld [vmem:[%s3000_s21 + $0x8] sm:$0xff]  }
 0x5f7   : > { %974 = vadd.xlane.f32.xlu0 %v973_v55 }
 0x607   : > { %1088 = vrot.lane.b32.xlu1 %v3075_v2, %s2899_s23 }
 0x60d   : > { %1136 = vrot.lane.b32.xlu0 %v3073_v1, %s2899_s23 }
 0x61a   : > { %v972_v56 = vpop.xlane.xlu1 %971  ;;  %v969_v57 = vpop.xlane.xlu0 %968 }
 0x61b   : > { %2816 = vrcp.f32 %v972_v56 }
 0x61c   : > { %2818 = vrcp.f32 %v969_v57 }
 0x625   : > { %v2817_v58 = vpop.eup %2816 }
 0x626   : > { %v2819_v59 = vpop.eup %2818  ;;  %v984_v60 = vmul.f32 %v2817_v58, %v2809_v35 }
 0x627   : > { %v983_v61 = vmul.f32 %v2819_v59, %v2811_v36 }
 0x628   : > { %v988_v62 = vpack.c.bf16 %v984_v60, %v984_v60 }
 0x629   : > { %v987_v63 = vpack.c.bf16 %v983_v61, %v983_v61 }
 0x62a   : > { %2615 = vmatmul.mubr.msk.bf16.vlgmr.msra.gmra.mrb[8].mxu0 %vm942_vm8, %v988_v62 }
 0x62b   : > { %2609 = vmatmul.mubr.msk.bf16.vlgmr.msra.gmra.mrb[12].mxu1 %vm942_vm8, %v987_v63  ;;  %2626 = vmatprep.mubr.msk.bf16.mxu0 %vm2896_vm5, %v2895_v48 }
 0x62c   : > { %2620 = vmatprep.mubr.msk.bf16.mxu1 %vm2896_vm5, %v2895_v48 }
 0x683   : > { %v978_v0 = vpop.xlane.xlu1 %977 }
 0x684   : > { %2820 = vrcp.f32 %v978_v0  ;;  %v975_v1 = vpop.xlane.xlu0 %974 }
 0x685   : > { %2822 = vrcp.f32 %v975_v1  ;;  %v1321_v1 = vlaneseq }
 0x687   : > { %v1089_v2 = vpop.permute.xlu1 %1088 }
 0x688   : > { %v1094_v3 = vsel %vm996_vm9, %v1089_v2, 0  ;;  %v1137_v4 = vpop.permute.xlu0 %1136 }
 0x689   : > { %v1142_v5 = vsel %vm996_vm9, %v1137_v4, 0  ;;  %2619 = vmatpush3.bf16.msra.mxu1 %v1094_v3 }
 0x68a   : > { %2625 = vmatpush3.bf16.msra.mxu0 %v1142_v5  ;;  %2630 = vmatprep.subr.bf16.mxu1 %v2895_v48 }
 0x68b   : > { %2636 = vmatprep.subr.bf16.mxu0 %v2895_v48 }
 0x68e   : > { %v2821_v6 = vpop.eup %2820 }
 0x68f   : > { %v2823_v7 = vpop.eup %2822  ;;  %v986_v8 = vmul.f32 %v2821_v6, %v2813_v52 }
 0x690   : > { %v985_v9 = vmul.f32 %v2823_v7, %v2815_v53  ;;  %v2798_v53 = vld [vmem:[%s3000_s21] sm:$0xff]  }
 0x691   : > { %v990_v11 = vpack.c.bf16 %v986_v8, %v986_v8  ;;  %v1394_v7 = vld [vmem:[%s3352_s4] sm:$0xff]  ;;  %v1395_v8 = vld [vmem:[%s3352_s4 + $0x8] sm:$0xff] }
 0x692   : > { %v989_v13 = vpack.c.bf16 %v985_v9, %v985_v9  ;;  %v3170_v9 = vshrl.u32 %v1321_v1, 7 }
 0x693   : > { %2627 = vmatmul.mubr.msk.bf16.vlgmr.msra.gmra.mrb[12].mxu0 %vm942_vm8, %v990_v11  ;;  %v1396_v11 = vpack.c.bf16 %v1395_v8, %v1394_v7 }
 0x694   : > { %2621 = vmatmul.mubr.msk.bf16.vlgmr.msra.gmra.mrb[16].mxu1 %vm942_vm8, %v989_v13  ;;  %2637 = vmatpush3.bf16.msra.mxu0 %v2797_v10  ;;  %v3176_v13 = vld [vmem:[%s3020_s20] sm:$0xff] }
 0x695   : > { %2631 = vmatpush3.bf16.msra.mxu1 %v2796_v12  ;;  %2632 = vmatprep.mubr.msk.bf16.mxu1 %vm2896_vm5, %v2895_v48  ;;  %v1323_v12 = vsub.s32 0, %v3170_v9 }
 0x696   : > { %2638 = vmatprep.mubr.msk.bf16.mxu0 %vm2896_vm5, %v2895_v48  ;;  %2650 = vmatprep.subr.bf16.mxu0 %v2895_v48 }
 0x697   : > { %2642 = vmatprep.subr.bf16.mxu1 %v2895_v48 }
 0x6fd   : > { %v1082_v14 = vpop.f32.mrb[8].mxu0 }
 0x6fe   : > { %v1034_v15 = vpop.f32.mrb[12].mxu1  ;;  %v2616_v16 = vpop.f32.mrb[9].mxu0 }
 0x6ff   : > { %v1184_v17 = vpack.c.bf16 %v1082_v14, %v1034_v15  ;;  %v2610_v18 = vpop.f32.mrb[13].mxu1  ;;  %v1085_v19 = vpop.f32.mrb[10].mxu0  ;;  %v1324_v14 = vrot.slane %v3176_v13, %v1323_v12  ;;  %v1329_v15 = vsub.s32 1, %v3170_v9 }
 0x700   : > { %v1037_v20 = vpop.f32.mrb[14].mxu1  ;;  %v2617_v21 = vpop.f32.mrb[11].mxu0 }
 0x701   : > { %v2611_v22 = vpop.f32.mrb[15].mxu1  ;;  %2633 = vmatmul.mubr.msk.bf16.vlgmr.msra.gmra.mrb[20].mxu1 %vm748_vm7, %v1184_v17  ;;  %v1330_v21 = vrot.slane %v3176_v13, %v1329_v15 }
 0x702   : > { %2646 = vmatprep.mubr.msk.bf16.mxu1 %vm2896_vm5, %v2895_v48  ;;  %2643 = vmatpush3.bf16.msra.mxu1 %v2798_v53 }
 0x703   : > { %2644 = vmatprep.subr.bf16.mxu1 %v2895_v48 }
 0x706   : > { %2645 = vmatpush3.bf16.msra.mxu1 %v2799_v54 }
 0x707   : > { %2658 = vmatprep.subr.bf16.mxu1 %v2895_v48 }
 0x766   : > { %v1178_v23 = vpop.f32.mrb[12].mxu0 }
 0x767   : > { %v1130_v24 = vpop.f32.mrb[16].mxu1  ;;  %v2628_v25 = vpop.f32.mrb[13].mxu0 }
 0x768   : > { %v1185_v26 = vpack.c.bf16 %v1178_v23, %v1130_v24  ;;  %v2622_v27 = vpop.f32.mrb[17].mxu1  ;;  %v1181_v28 = vpop.f32.mrb[14].mxu0 }
 0x769   : > { %v1133_v29 = vpop.f32.mrb[18].mxu1  ;;  %v2629_v30 = vpop.f32.mrb[15].mxu0 }
 0x76a   : > { %v2623_v31 = vpop.f32.mrb[19].mxu1  ;;  %2639 = vmatmul.mubr.msk.bf16.vlgmr.msra.gmra.mrb[16].mxu0 %vm748_vm7, %v1185_v26 }
 0x76b   : > { %2654 = vmatprep.mubr.msk.bf16.mxu0 %vm2896_vm5, %v2895_v48 }
 0x7d4   : > { %v1229_v32 = vpop.f32.mrb[20].mxu1 }
 0x7d5   : > { %v2634_v33 = vpop.f32.mrb[21].mxu1  ;;  %v1286_v37 = vsel %vm684_vm6, %v1229_v32, 0.0 }
 0x7d6   : > { %v1232_v34 = vpop.f32.mrb[22].mxu1 }
 0x7d7   : > { %v2635_v35 = vpop.f32.mrb[23].mxu1  ;;  %v1289_v42 = vsel %vm684_vm6, %v1232_v34, 0.0 }
 0x83d   : > { %v1279_v36 = vpop.f32.mrb[16].mxu0 }
 0x83e   : > { %v1287_v38 = vsel %vm684_vm6, %v1279_v36, 0.0  ;;  %v2640_v39 = vpop.f32.mrb[17].mxu0 }
 0x83f   : > { %v1288_v40 = vadd.f32 %v1287_v38, %v1286_v37  ;;  %v1282_v41 = vpop.f32.mrb[18].mxu0 }
 0x840   : > { %v1290_v43 = vsel %vm684_vm6, %v1282_v41, 0.0  ;;  %v2641_v44 = vpop.f32.mrb[19].mxu0 }
 0x841   : > { %v1291_v45 = vadd.f32 %v1290_v43, %v1289_v42  ;;  %v1292_v46 = vadd.f32 %v1288_v40, %v3053_v50 }
 0x843   : > { %v1294_v47 = vsel %vm684_vm6, %v1292_v46, 0.0  ;;  %v1293_v49 = vadd.f32 %v1291_v45, %v3055_v51 }
 0x844   : > { %1295 = vadd.xlane.f32.xlu1 %v1294_v47 }
 0x845   : > { %v1297_v52 = vsel %vm684_vm6, %v1293_v49, 0.0 }
 0x846   : > { %1298 = vadd.xlane.f32.xlu0 %v1297_v52 }
 0x8d1   : > { %v1296_v55 = vpop.xlane.xlu1 %1295 }
 0x8d2   : > { %v1301_v56 = vmul.f32 0.03125, %v1296_v55 }
 0x8d3   : > { %v1299_v57 = vpop.xlane.xlu0 %1298 }
 0x8d4   : > { %v1303_v50 = vsub.f32 %v1292_v46, %v1301_v56  ;;  %v1302_v58 = vmul.f32 0.03125, %v1299_v57 }
 0x8d6   : > { %v1304_v59 = vsub.f32 %v1293_v49, %v1302_v58  ;;  %v1305_v60 = vmul.f32 %v1303_v50, %v1303_v50 }
 0x8d8   : > { %v1307_v51 = vsel %vm684_vm6, %v1305_v60, 0.0  ;;  %v1306_v61 = vmul.f32 %v1304_v59, %v1304_v59 }
 0x8d9   : > { %1308 = vadd.xlane.f32.xlu0 %v1307_v51 }
 0x8da   : > { %v1310_v62 = vsel %vm684_vm6, %v1306_v61, 0.0 }
 0x8db   : > { %1311 = vadd.xlane.f32.xlu1 %v1310_v62 }
 0x8ec   : > { %1399 = vrot.lane.b32.xlu1 %v2799_v54, %s2898_s22 }
 0x8ef   : > { %1397 = vrot.lane.b32.xlu0 %v2798_v53, %s2898_s22 }
 0x966   : > { %v1309_v63 = vpop.xlane.xlu0 %1308 }
 0x967   : > { %v1313_v0 = vmul.f32 0.03125, %v1309_v63 }
 0x968   : > { %v1312_v2 = vpop.xlane.xlu1 %1311 }
 0x969   : > { %v1315_v3 = vadd.f32 1e-06, %v1313_v0  ;;  %v1314_v4 = vmul.f32 0.03125, %v1312_v2 }
 0x96a   : > { %v1398_v5 = vpop.permute.xlu0 %1397 }
 0x96b   : > { %2824 = vrsqrt.f32 %v1315_v3  ;;  %v1316_v6 = vadd.f32 1e-06, %v1314_v4  ;;  %2651 = vmatpush3.bf16.msra.mxu0 %v1398_v5 }
 0x96c   : > { %v1400_v10 = vpop.permute.xlu1 %1399  ;;  %2652 = vmatprep.subr.bf16.mxu0 %v2895_v48 }
 0x96d   : > { %2826 = vrsqrt.f32 %v1316_v6 }
 0x96f   : > { %2653 = vmatpush3.bf16.msra.mxu0 %v1400_v10 }
 0x970   : > { %2664 = vmatprep.subr.bf16.mxu0 %v2895_v48 }
 0x972   : > { %2655 = vmatmul.mubr.msk.bf16.vlgmr.msra.gmra.mrb[20].mxu0 %vm684_vm6, %v1396_v11 }
 0x973   : > { %2666 = vmatprep.mubr.msk.bf16.mxu0 %vm2896_vm5, %v2895_v48 }
 0x975   : > { %v2825_v16 = vpop.eup %2824 }
 0x976   : > { %v1319_v17 = vmul.f32 %v2825_v16, %v1303_v50 }
 0x977   : > { %v2827_v18 = vpop.eup %2826 }
 0x978   : > { %v1325_v19 = vmul.f32 %v1324_v14, %v1319_v17  ;;  %v1320_v20 = vmul.f32 %v2827_v18, %v1304_v59 }
 0x97a   : > { %v1326_v22 = vmul.f32 %v1324_v14, %v1320_v20  ;;  %v3184_v23 = vadd.f32 %v1330_v21, %v1325_v19 }
 0x97c   : > { %v3186_v24 = vadd.f32 %v1330_v21, %v1326_v22 }
 0x97e   : > { %v1337_v25 = vpack.c.bf16 %v3186_v24, %v3184_v23 }
 0x980   : > { %2647 = vmatmul.mubr.msk.bf16.vlgmr.msra.gmra.mrb[24].mxu1 %vm684_vm6, %v1337_v25 }
 0x981   : > { %2660 = vmatprep.mubr.msk.bf16.mxu1 %vm2896_vm5, %v2895_v48 }
 0xa45   : > { %v1440_v26 = vpop.f32.mrb[20].mxu0 }
 0xa46   : > { %v3193_v27 = vpack.c.bf16 %v1440_v26, %v1440_v26  ;;  %v2656_v28 = vpop.f32.mrb[21].mxu0 }
 0xa47   : > { %v1443_v29 = vpop.f32.mrb[22].mxu0 }
 0xa48   : > { %v2784_v30 = vpack.i.bf16 %v1443_v29, %v1440_v26  ;;  %v3195_v31 = vpack.c.bf16 %v1443_v29, %v1443_v29  ;;  %v2657_v32 = vpop.f32.mrb[23].mxu0  ;;  %v1479_v33 = vsel %vm748_vm7, %v3193_v27, 0 }
 0xa49   : > { %2659 = vmatpush3.bf16.xpose.msra.mxu1 %v1479_v33 }
 0xa4a   : > { %2785 = vrot.lane.b32.xlu1 %v2784_v30, %s2897_s15  ;;  %v1525_v34 = vsel %vm748_vm7, %v3195_v31, 0  ;;  %2670 = vmatprep.subr.bf16.mxu1 %v2895_v48 }
 0xa4b   : > { %2665 = vmatpush3.bf16.xpose.msra.mxu0 %v1525_v34 }
 0xa4c   : > { %2676 = vmatprep.subr.bf16.mxu0 %v2895_v48 }
 0xa53   : > { %v1387_v35 = vpop.f32.mrb[24].mxu1 }
 0xa54   : > { %v1467_v36 = vpack.c.bf16 %v1387_v35, %v1387_v35  ;;  %v2648_v37 = vpop.f32.mrb[25].mxu1 }
 0xa55   : > { %v1390_v38 = vpop.f32.mrb[26].mxu1 }
 0xa56   : > { %v2789_v39 = vpack.i.bf16 %v1390_v38, %v1387_v35  ;;  %v1468_v40 = vpack.c.bf16 %v1390_v38, %v1390_v38  ;;  %v2649_v41 = vpop.f32.mrb[27].mxu1  ;;  %2661 = vmatmul.mubr.msk.bf16.vlgmr.msra.gmra.mrb[28].mxu1 %vm748_vm7, %v1467_v36 }
 0xa57   : > { %2672 = vmatprep.mubr.msk.bf16.mxu1 %vm2896_vm5, %v2895_v48 }
 0xa58   : > { %2790 = vrot.lane.b32.xlu0 %v2789_v39, %s2897_s15  ;;  %2667 = vmatmul.mubr.msk.bf16.vlgmr.msra.gmra.mrb[24].mxu0 %vm748_vm7, %v1468_v40 }
 0xa59   : > { %2678 = vmatprep.mubr.msk.bf16.mxu0 %vm2896_vm5, %v2895_v48 }
 0xabc   : > { %v2786_v42 = vpop.permute.xlu1 %2785 }
 0xabd   : > { %v2788_v43 = vunpack.i.h.bf16 %v2786_v42  ;;  %v2787_v44 = vunpack.i.l.bf16 %v2786_v42 }
 0xabf   : > { %v3211_v45 = vpack.c.bf16 %v2788_v43, %v2788_v43  ;;  %v3213_v46 = vpack.c.bf16 %v2787_v44, %v2787_v44 }
 0xac1   : > { %v1571_v47 = vsel %vm748_vm7, %v3213_v46, 0  ;;  %v1617_v49 = vsel %vm748_vm7, %v3211_v45, 0 }
 0xac2   : > { %2671 = vmatpush3.bf16.xpose.msra.mxu1 %v1571_v47  ;;  %2677 = vmatpush3.bf16.xpose.msra.mxu0 %v1617_v49 }
 0xac3   : > { %2682 = vmatprep.subr.bf16.mxu1 %v2895_v48  ;;  %2688 = vmatprep.subr.bf16.mxu0 %v2895_v48 }
 0xaca   : > { %v2791_v52 = vpop.permute.xlu0 %2790 }
 0xacb   : > { %v2793_v53 = vunpack.i.h.bf16 %v2791_v52  ;;  %v2792_v54 = vunpack.i.l.bf16 %v2791_v52 }
 0xacd   : > { %v1470_v55 = vpack.c.bf16 %v2793_v53, %v2793_v53  ;;  %v1469_v56 = vpack.c.bf16 %v2792_v54, %v2792_v54 }
 0xacf   : > { %2673 = vmatmul.mubr.msk.bf16.vlgmr.msra.gmra.mrb[32].mxu1 %vm748_vm7, %v1469_v56  ;;  %2679 = vmatmul.mubr.msk.bf16.vlgmr.msra.gmra.mrb[28].mxu0 %vm748_vm7, %v1470_v55 }
 0xad0   : > { %2684 = vmatprep.mubr.msk.bf16.mxu1 %vm2896_vm5, %v2895_v48  ;;  %2690 = vmatprep.mubr.msk.bf16.mxu0 %vm2896_vm5, %v2895_v48 }
 0xb29   : > { %v1515_v57 = vpop.f32.mrb[28].mxu1 }
 0xb2a   : > { %v2662_v50 = vpop.f32.mrb[29].mxu1  ;;  %v1659_v58 = vsel %vm942_vm8, %v1515_v57, -inf }
 0xb2b   : > { %v1561_v59 = vpop.f32.mrb[24].mxu0  ;;  %1660 = vmax.xlane.f32.xlu1 %v1659_v58  ;;  %v1518_v60 = vpop.f32.mrb[30].mxu1 }
 0xb2c   : > { %v2663_v51 = vpop.f32.mrb[31].mxu1  ;;  %v2668_v61 = vpop.f32.mrb[25].mxu0  ;;  %v1662_v62 = vsel %vm942_vm8, %v1561_v59, -inf }
 0xb2d   : > { %1663 = vmax.xlane.f32.xlu0 %v1662_v62  ;;  %v1564_v63 = vpop.f32.mrb[26].mxu0  ;;  %v2800_v51 = vld [vmem:[%s3005_s24] sm:$0xff]  }
 0xb2e   : > { %v2669_v0 = vpop.f32.mrb[27].mxu0 }
 0xba2   : > { %v1607_v1 = vpop.f32.mrb[32].mxu1  ;;  %v1653_v2 = vpop.f32.mrb[28].mxu0 }
 0xba3   : > { %v2674_v3 = vpop.f32.mrb[33].mxu1  ;;  %v2680_v4 = vpop.f32.mrb[29].mxu0  ;;  %v1668_v5 = vsel %vm942_vm8, %v1653_v2, -inf  ;;  %v1665_v6 = vsel %vm942_vm8, %v1607_v1, -inf }
 0xba4   : > { %v1656_v7 = vpop.f32.mrb[30].mxu0  ;;  %1669 = vmax.xlane.f32.xlu1 %v1668_v5  ;;  %1666 = vmax.xlane.f32.xlu0 %v1665_v6  ;;  %v1610_v8 = vpop.f32.mrb[34].mxu1 }
 0xba5   : > { %v2675_v10 = vpop.f32.mrb[35].mxu1  ;;  %v2681_v11 = vpop.f32.mrb[31].mxu0 }
 0xbb5   : > { %1757 = vrot.lane.b32.xlu1 %v3195_v31, %s2898_s22 }
 0xbb8   : > { %v1661_v12 = vpop.xlane.xlu1 %1660 }
 0xbb9   : > { %v1671_v15 = vsub.f32 %v1515_v57, %v1661_v12 }
 0xbba   : > { %1708 = vrot.lane.b32.xlu0 %v3193_v27, %s2898_s22  ;;  %v1664_v14 = vpop.xlane.xlu0 %1663 }
 0xbbb   : > { %v1672_v16 = vsub.f32 %v1561_v59, %v1664_v14  ;;  %v1675_v17 = vmul.f32 1.442695, %v1671_v15  ;;  %v2801_v59 = vld [vmem:[%s3005_s24 + $0x8] sm:$0xff]  }
 0xbbd   : > { %v1677_v18 = vmul.f32 1.442695, %v1672_v16  ;;  %2828 = vpow2.f32 %v1675_v17 }
 0xbbf   : > { %2830 = vpow2.f32 %v1677_v18 }
 0xbc7   : > { %v2829_v19 = vpop.eup %2828 }
 0xbc8   : > { %v1683_v22 = vsel %vm942_vm8, %v2829_v19, 0.0 }
 0xbc9   : > { %v2831_v20 = vpop.eup %2830 }
 0xbca   : > { %v1686_v21 = vsel %vm942_vm8, %v2831_v20, 0.0 }
 0xbd9   : > { %1687 = vadd.xlane.f32.xlu1 %v1686_v21  ;;  %1684 = vadd.xlane.f32.xlu0 %v1683_v22 }
 0xc31   : > { %v1670_v25 = vpop.xlane.xlu1 %1669  ;;  %v1667_v26 = vpop.xlane.xlu0 %1666 }
 0xc32   : > { %v1674_v28 = vsub.f32 %v1653_v2, %v1670_v25  ;;  %v1673_v27 = vsub.f32 %v1607_v1, %v1667_v26 }
 0xc34   : > { %v1681_v29 = vmul.f32 1.442695, %v1674_v28  ;;  %v1679_v30 = vmul.f32 1.442695, %v1673_v27 }
 0xc35   : > { %v1758_v31 = vpop.permute.xlu1 %1757  ;;  %v1709_v32 = vpop.permute.xlu0 %1708 }
 0xc36   : > { %2832 = vpow2.f32 %v1681_v29  ;;  %v1763_v33 = vsel %vm996_vm9, %v1758_v31, 0  ;;  %v1714_v34 = vsel %vm996_vm9, %v1709_v32, 0 }
 0xc37   : > { %2834 = vpow2.f32 %v1679_v30  ;;  %2683 = vmatpush3.bf16.msra.mxu1 %v1714_v34  ;;  %2689 = vmatpush3.bf16.msra.mxu0 %v1763_v33 }
 0xc38   : > { %2694 = vmatprep.subr.bf16.mxu1 %v2895_v48  ;;  %2700 = vmatprep.subr.bf16.mxu0 %v2895_v48 }
 0xc40   : > { %v2833_v35 = vpop.eup %2832 }
 0xc41   : > { %v2835_v36 = vpop.eup %2834  ;;  %v1692_v37 = vsel %vm942_vm8, %v2833_v35, 0.0 }
 0xc42   : > { %1693 = vadd.xlane.f32.xlu1 %v1692_v37  ;;  %v1689_v38 = vsel %vm942_vm8, %v2835_v36, 0.0 }
 0xc43   : > { %1690 = vadd.xlane.f32.xlu0 %v1689_v38 }
 0xc53   : > { %1806 = vrot.lane.b32.xlu1 %v3213_v46, %s2898_s22 }
 0xc59   : > { %1855 = vrot.lane.b32.xlu0 %v3211_v45, %s2898_s22 }
 0xc66   : > { %v1688_v39 = vpop.xlane.xlu1 %1687  ;;  %v1685_v40 = vpop.xlane.xlu0 %1684 }
 0xc67   : > { %2836 = vrcp.f32 %v1688_v39 }
 0xc68   : > { %2838 = vrcp.f32 %v1685_v40 }
 0xc71   : > { %v2837_v41 = vpop.eup %2836 }
 0xc72   : > { %v2839_v42 = vpop.eup %2838  ;;  %v1700_v43 = vmul.f32 %v2837_v41, %v2831_v20 }
 0xc73   : > { %v1699_v44 = vmul.f32 %v2839_v42, %v2829_v19 }
 0xc74   : > { %v1704_v47 = vpack.c.bf16 %v1700_v43, %v1700_v43 }
 0xc75   : > { %v1703_v49 = vpack.c.bf16 %v1699_v44, %v1699_v44 }
 0xc76   : > { %2691 = vmatmul.mubr.msk.bf16.vlgmr.msra.gmra.mrb[32].mxu0 %vm942_vm8, %v1704_v47 }
 0xc77   : > { %2685 = vmatmul.mubr.msk.bf16.vlgmr.msra.gmra.mrb[36].mxu1 %vm942_vm8, %v1703_v49  ;;  %2702 = vmatprep.mubr.msk.bf16.mxu0 %vm2896_vm5, %v2895_v48  ;;  %v2802_v49 = vld [vmem:[%s3010_s30] sm:$0xff]  }
 0xc78   : > { %2696 = vmatprep.mubr.msk.bf16.mxu1 %vm2896_vm5, %v2895_v48 }
 0xccf   : > { %v1694_v45 = vpop.xlane.xlu1 %1693 }
 0xcd0   : > { %2840 = vrcp.f32 %v1694_v45  ;;  %v1691_v46 = vpop.xlane.xlu0 %1690  ;;  %v2803_v45 = vld [vmem:[%s3010_s30 + $0x8] sm:$0xff]  }
 0xcd1   : > { %2842 = vrcp.f32 %v1691_v46  ;;  %v2804_v46 = vld [vmem:[%s3015_s16] sm:$0xff]  }
 0xcd3   : > { %v1807_v52 = vpop.permute.xlu1 %1806 }
 0xcd4   : > { %v1812_v53 = vsel %vm996_vm9, %v1807_v52, 0  ;;  %v1856_v54 = vpop.permute.xlu0 %1855  ;;  %v2805_v52 = vld [vmem:[%s3015_s16 + $0x8] sm:$0xff]  }
 0xcd5   : > { %v1861_v55 = vsel %vm996_vm9, %v1856_v54, 0  ;;  %2695 = vmatpush3.bf16.msra.mxu1 %v1812_v53 }
 0xcd6   : > { %2701 = vmatpush3.bf16.msra.mxu0 %v1861_v55  ;;  %2706 = vmatprep.subr.bf16.mxu1 %v2895_v48 }
 0xcd7   : > { %2712 = vmatprep.subr.bf16.mxu0 %v2895_v48 }
 0xcda   : > { %v2841_v56 = vpop.eup %2840 }
 0xcdb   : > { %v2843_v57 = vpop.eup %2842  ;;  %v1702_v50 = vmul.f32 %v2841_v56, %v2833_v35 }
 0xcdc   : > { %v1701_v58 = vmul.f32 %v2843_v57, %v2835_v36 }
 0xcdd   : > { %v1706_v60 = vpack.c.bf16 %v1702_v50, %v1702_v50 }
 0xcde   : > { %v1705_v61 = vpack.c.bf16 %v1701_v58, %v1701_v58  ;;  %v2041_v58 = vsub.s32 2, %v3170_v9 }
 0xcdf   : > { %2703 = vmatmul.mubr.msk.bf16.vlgmr.msra.gmra.mrb[36].mxu0 %vm942_vm8, %v1706_v60  ;;  %v2047_v60 = vsub.s32 3, %v3170_v9 }
 0xce0   : > { %2697 = vmatmul.mubr.msk.bf16.vlgmr.msra.gmra.mrb[40].mxu1 %vm942_vm8, %v1705_v61  ;;  %2713 = vmatpush3.bf16.msra.mxu0 %v2801_v59  ;;  %v2042_v59 = vrot.slane %v3176_v13, %v2041_v58 }
 0xce1   : > { %2707 = vmatpush3.bf16.msra.mxu1 %v2800_v51  ;;  %2708 = vmatprep.mubr.msk.bf16.mxu1 %vm2896_vm5, %v2895_v48 }
 0xce2   : > { %2714 = vmatprep.mubr.msk.bf16.mxu0 %vm2896_vm5, %v2895_v48  ;;  %2718 = vmatprep.subr.bf16.mxu1 %v2895_v48 }
 0xce3   : > { %2726 = vmatprep.subr.bf16.mxu0 %v2895_v48 }
 0xd49   : > { %v1799_v62 = vpop.f32.mrb[32].mxu0 }
 0xd4a   : > { %v1750_v63 = vpop.f32.mrb[36].mxu1  ;;  %v2692_v0 = vpop.f32.mrb[33].mxu0 }
 0xd4b   : > { %v1903_v1 = vpack.c.bf16 %v1799_v62, %v1750_v63  ;;  %v2686_v2 = vpop.f32.mrb[37].mxu1  ;;  %v1802_v3 = vpop.f32.mrb[34].mxu0 }
 0xd4c   : > { %v1753_v4 = vpop.f32.mrb[38].mxu1  ;;  %v2693_v5 = vpop.f32.mrb[35].mxu0 }
 0xd4d   : > { %v2687_v6 = vpop.f32.mrb[39].mxu1  ;;  %2709 = vmatmul.mubr.msk.bf16.vlgmr.msra.gmra.mrb[44].mxu1 %vm748_vm7, %v1903_v1  ;;  %v2048_v1 = vrot.slane %v3176_v13, %v2047_v60 }
 0xd4e   : > { %2722 = vmatprep.mubr.msk.bf16.mxu1 %vm2896_vm5, %v2895_v48  ;;  %2719 = vmatpush3.bf16.msra.mxu1 %v2802_v49  ;;  %v2806_v6 = vld [vmem:[%s3015_s16 + $0x10] sm:$0xff]  }
 0xd4f   : > { %2720 = vmatprep.subr.bf16.mxu1 %v2895_v48 }
 0xd52   : > { %2721 = vmatpush3.bf16.msra.mxu1 %v2803_v45 }
 0xdb2   : > { %v1897_v7 = vpop.f32.mrb[36].mxu0 }
 0xdb3   : > { %v1848_v8 = vpop.f32.mrb[40].mxu1  ;;  %v2704_v10 = vpop.f32.mrb[37].mxu0 }
 0xdb4   : > { %v1904_v11 = vpack.c.bf16 %v1897_v7, %v1848_v8  ;;  %v2698_v12 = vpop.f32.mrb[41].mxu1  ;;  %v1900_v14 = vpop.f32.mrb[38].mxu0  ;;  %v2807_v7 = vld [vmem:[%s3015_s16 + $0x18] sm:$0xff]   ;;  %v2058_v8 = vsub.s32 4, %v3170_v9 }
 0xdb5   : > { %v1851_v15 = vpop.f32.mrb[42].mxu1  ;;  %v2705_v16 = vpop.f32.mrb[39].mxu0 }
 0xdb6   : > { %v2699_v17 = vpop.f32.mrb[43].mxu1  ;;  %2715 = vmatmul.mubr.msk.bf16.vlgmr.msra.gmra.mrb[40].mxu0 %vm748_vm7, %v1904_v11  ;;  %v2059_v10 = vrot.slane %v3176_v13, %v2058_v8 }
 0xdb7   : > { %2734 = vmatprep.mubr.msk.bf16.mxu0 %vm2896_vm5, %v2895_v48  ;;  %2727 = vmatpush3.bf16.msra.mxu0 %v2804_v46  ;;  %v2230_v46 = vsub.s32 6, %v3170_v9 }
 0xdb8   : > { %2728 = vmatprep.subr.bf16.mxu0 %v2895_v48 }
 0xdbb   : > { %2729 = vmatpush3.bf16.msra.mxu0 %v2805_v52  ;;  %v2236_v52 = vsub.s32 7, %v3170_v9 }
 0xdbc   : > { %2730 = vmatprep.subr.bf16.mxu0 %v2895_v48 }
 0xdbf   : > { %2731 = vmatpush3.bf16.msra.mxu0 %v2806_v6 }
 0xdc0   : > { %2732 = vmatprep.subr.bf16.mxu0 %v2895_v48 }
 0xdc3   : > { %2733 = vmatpush3.bf16.msra.mxu0 %v2807_v7 }
 0xe20   : > { %v1948_v18 = vpop.f32.mrb[44].mxu1 }
 0xe21   : > { %v2710_v19 = vpop.f32.mrb[45].mxu1  ;;  %v2005_v25 = vsel %vm684_vm6, %v1948_v18, 0.0 }
 0xe22   : > { %v1951_v20 = vpop.f32.mrb[46].mxu1 }
 0xe23   : > { %v2711_v21 = vpop.f32.mrb[47].mxu1  ;;  %v2008_v30 = vsel %vm684_vm6, %v1951_v20, 0.0 }
 0xe24   : > { %v2129_v21 = vsub.s32 5, %v3170_v9  ;;  %v2852_v9 = vld [vmem:[%s3360_s12] sm:$0xff] (!%p2492_p5)  }
 0xe26   : > { %v2130_v48 = vrot.slane %v3176_v13, %v2129_v21 }
 0xe89   : > { %v1998_v22 = vpop.f32.mrb[40].mxu0 }
 0xe8a   : > { %v2006_v26 = vsel %vm684_vm6, %v1998_v22, 0.0  ;;  %v2716_v28 = vpop.f32.mrb[41].mxu0 }
 0xe8b   : > { %v2007_v27 = vadd.f32 %v2006_v26, %v2005_v25  ;;  %v2001_v29 = vpop.f32.mrb[42].mxu0 }
 0xe8c   : > { %v2009_v31 = vsel %vm684_vm6, %v2001_v29, 0.0  ;;  %v2717_v32 = vpop.f32.mrb[43].mxu0 }
 0xe8d   : > { %v2010_v33 = vadd.f32 %v2009_v31, %v2008_v30  ;;  %v2011_v34 = vadd.f32 %v2007_v27, %v3184_v23 }
 0xe8f   : > { %v2013_v35 = vsel %vm684_vm6, %v2011_v34, 0.0  ;;  %v2012_v36 = vadd.f32 %v2010_v33, %v3186_v24 }
 0xe90   : > { %2014 = vadd.xlane.f32.xlu1 %v2013_v35 }
 0xe91   : > { %v2016_v37 = vsel %vm684_vm6, %v2012_v36, 0.0 }
 0xe92   : > { %2017 = vadd.xlane.f32.xlu0 %v2016_v37 }
 0xf1d   : > { %v2015_v38 = vpop.xlane.xlu1 %2014 }
 0xf1e   : > { %v2019_v39 = vmul.f32 0.03125, %v2015_v38 }
 0xf1f   : > { %v2018_v40 = vpop.xlane.xlu0 %2017 }
 0xf20   : > { %v2021_v41 = vsub.f32 %v2011_v34, %v2019_v39  ;;  %v2020_v42 = vmul.f32 0.03125, %v2018_v40 }
 0xf22   : > { %v2022_v43 = vsub.f32 %v2012_v36, %v2020_v42  ;;  %v2023_v44 = vmul.f32 %v2021_v41, %v2021_v41 }
 0xf24   : > { %v2025_v23 = vsel %vm684_vm6, %v2023_v44, 0.0  ;;  %v2024_v47 = vmul.f32 %v2022_v43, %v2022_v43 }
 0xf25   : > { %2026 = vadd.xlane.f32.xlu0 %v2025_v23 }
 0xf26   : > { %v2028_v24 = vsel %vm684_vm6, %v2024_v47, 0.0 }
 0xf27   : > { %2029 = vadd.xlane.f32.xlu1 %v2028_v24 }
 0xfb2   : > { %v2027_v53 = vpop.xlane.xlu0 %2026 }
 0xfb3   : > { %v2031_v54 = vmul.f32 0.03125, %v2027_v53  ;;  %v2231_v53 = vrot.slane %v3176_v13, %v2230_v46 }
 0xfb4   : > { %v2030_v55 = vpop.xlane.xlu1 %2029 }
 0xfb5   : > { %v2033_v56 = vadd.f32 1e-06, %v2031_v54  ;;  %v2032_v57 = vmul.f32 0.03125, %v2030_v55  ;;  %v2237_v55 = vrot.slane %v3176_v13, %v2236_v52  ;;  %v2853_v13 = vld [vmem:[%s3360_s12 + $0x8] sm:$0xff] (!%p2492_p5)  }
 0xfb7   : > { %2844 = vrsqrt.f32 %v2033_v56  ;;  %v2034_v50 = vadd.f32 1e-06, %v2032_v57 }
 0xfb9   : > { %2846 = vrsqrt.f32 %v2034_v50 }
 0xfc1   : > { %v2845_v51 = vpop.eup %2844 }
 0xfc2   : > { %v2037_v61 = vmul.f32 %v2845_v51, %v2021_v41 }
 0xfc3   : > { %v2847_v62 = vpop.eup %2846 }
 0xfc4   : > { %v2043_v63 = vmul.f32 %v2042_v59, %v2037_v61  ;;  %v2038_v0 = vmul.f32 %v2847_v62, %v2022_v43  ;;  %v2900_v61 = vmov (!%p2492_p5), 0.0  }
 0xfc5   : > { %2738 = vmatprep.subr.bf16.mxu0 (!%p2492_p5), %v2900_v61 }
 0xfc6   : > { %v2044_v2 = vmul.f32 %v2042_v59, %v2038_v0  ;;  %v2049_v3 = vadd.f32 %v2048_v1, %v2043_v63 }
 0xfc8   : > { %v2050_v4 = vadd.f32 %v2048_v1, %v2044_v2 }
 0xfca   : > { %v2051_v5 = vpack.c.bf16 %v2050_v4, %v2049_v3 }
 0xfcc   : > { %2723 = vmatmul.mubr.msk.bf16.vlgmr.msra.gmra.mrb[48].mxu1 %vm684_vm6, %v2051_v5 }
0x109f   : > { %v2109_v11 = vpop.f32.mrb[48].mxu1 }
0x10a0   : > { %v2110_v12 = vadd.f32 %v2109_v11, %v2059_v10  ;;  %v2724_v14 = vpop.f32.mrb[49].mxu1 }
0x10a1   : > { %v2112_v15 = vpop.f32.mrb[50].mxu1 }
0x10a2   : > { %v2113_v16 = vadd.f32 %v2112_v15, %v2059_v10  ;;  %v2725_v17 = vpop.f32.mrb[51].mxu1  ;;  %v2116_v18 = vmax.f32 %v2110_v12, 0.0 }
0x10a4   : > { %v2117_v19 = vmax.f32 %v2113_v16, 0.0 }
0x10a6   : > { %v2118_v20 = vpack.c.bf16 %v2117_v19, %v2116_v18 }
0x10a8   : > { %2735 = vmatmul.mubr.msk.bf16.vlgmr.msra.gmra.mrb[44].mxu0 %vm2155_vm10, %v2118_v20 }
0x10a9   : > { %2739 = vmatpush3.bf16.msra.mxu0 (!%p2492_p5), %v2852_v9  ;;  %2742 = vmatprep.mubr.msk.bf16.mxu0 (!%p2492_p5), %vm2901_vm11, %v2900_v61 }
0x10aa   : > { %2740 = vmatprep.subr.bf16.mxu0 (!%p2492_p5), %v2900_v61 }
0x10ad   : > { %2741 = vmatpush3.bf16.msra.mxu0 (!%p2492_p5), %v2853_v13 }
0x117b   : > { %v2193_v22 = vpop.f32.mrb[44].mxu0 }
0x117c   : > { %v2194_v25 = vadd.f32 %v2193_v22, %v2130_v48  ;;  %v2736_v26 = vpop.f32.mrb[45].mxu0 }
0x117d   : > { %v2196_v28 = vpop.f32.mrb[46].mxu0 }
0x117e   : > { %v2197_v27 = vadd.f32 %v2196_v28, %v2130_v48  ;;  %v2737_v29 = vpop.f32.mrb[47].mxu0  ;;  %v2200_v30 = vadd.f32 %v2194_v25, %v2049_v3 }
0x1180   : > { %v2202_v31 = vsel %vm684_vm6, %v2200_v30, 0.0  ;;  %v2201_v32 = vadd.f32 %v2197_v27, %v2050_v4 }
0x1181   : > { %2203 = vadd.xlane.f32.xlu0 %v2202_v31 }
0x1182   : > { %v2205_v33 = vsel %vm684_vm6, %v2201_v32, 0.0 }
0x1183   : > { %2206 = vadd.xlane.f32.xlu1 %v2205_v33 }
0x120e   : > { %v2204_v34 = vpop.xlane.xlu0 %2203 }
0x120f   : > { %v2208_v35 = vmul.f32 0.03125, %v2204_v34 }
0x1210   : > { %v2207_v36 = vpop.xlane.xlu1 %2206 }
0x1211   : > { %v2210_v37 = vsub.f32 %v2200_v30, %v2208_v35  ;;  %v2209_v38 = vmul.f32 0.03125, %v2207_v36 }
0x1213   : > { %v2211_v39 = vsub.f32 %v2201_v32, %v2209_v38  ;;  %v2212_v40 = vmul.f32 %v2210_v37, %v2210_v37 }
0x1215   : > { %v2214_v41 = vsel %vm684_vm6, %v2212_v40, 0.0  ;;  %v2213_v42 = vmul.f32 %v2211_v39, %v2211_v39 }
0x1216   : > { %2215 = vadd.xlane.f32.xlu0 %v2214_v41 }
0x1217   : > { %v2217_v43 = vsel %vm684_vm6, %v2213_v42, 0.0 }
0x1218   : > { %2218 = vadd.xlane.f32.xlu1 %v2217_v43 }
0x12a3   : > { %v2216_v44 = vpop.xlane.xlu0 %2215 }
0x12a4   : > { %v2220_v23 = vmul.f32 0.03125, %v2216_v44 }
0x12a5   : > { %v2219_v47 = vpop.xlane.xlu1 %2218 }
0x12a6   : > { %v2222_v24 = vadd.f32 1e-06, %v2220_v23  ;;  %v2221_v49 = vmul.f32 0.03125, %v2219_v47 }
0x12a8   : > { %2848 = vrsqrt.f32 %v2222_v24  ;;  %v2223_v45 = vadd.f32 1e-06, %v2221_v49 }
0x12aa   : > { %2850 = vrsqrt.f32 %v2223_v45 }
0x12b2   : > { %v2849_v54 = vpop.eup %2848 }
0x12b3   : > { %v2226_v56 = vmul.f32 %v2849_v54, %v2210_v37 }
0x12b4   : > { %v2851_v57 = vpop.eup %2850 }
0x12b5   : > { %v2232_v50 = vmul.f32 %v2231_v53, %v2226_v56  ;;  %v2227_v58 = vmul.f32 %v2851_v57, %v2211_v39  ;;  %2245 = sbr.rel (%p2492_p5) target bundleno = 5012 (0x1394), region = 80 }
0x12b7   : > { %v2238_v59 = vadd.f32 %v2237_v55, %v2232_v50  ;;  %v2233_v60 = vmul.f32 %v2231_v53, %v2227_v58 }
0x12b9   : > { %2240 = vst.msk [vmem:[#allocation2] sm:$0xff] %vm684_vm6, %v2238_v59  ;;  %v2239_v51 = vadd.f32 %v2237_v55, %v2233_v60 }
0x12bb   : > { %2241 = vst.msk [vmem:[#allocation2 + $0x8] sm:$0xff] %vm684_vm6, %v2239_v51  ;;  %v2246_v62 = vpack.c.bf16 (!%p2492_p5), %v2239_v51, %v2238_v59 }
0x12bd   : > { %2743 = vmatmul.mubr.msk.bf16.vlgmr.msra.gmra.mrb[0].mxu0 %vm684_vm6, %v2246_v62 }
0x1390   : > { %v2300_v63 = vpop.f32.mrb[0].mxu0 }
0x1391   : > { %2307 = vst.msk [vmem:[#allocation3] sm:$0xff] %vm748_vm7, %v2300_v63  ;;  %v2744_v0 = vpop.f32.mrb[1].mxu0 }
0x1392   : > { %v2303_v1 = vpop.f32.mrb[2].mxu0 }
0x1393   : > { %2308 = vst.msk [vmem:[#allocation3 + $0x8] sm:$0xff] %vm748_vm7, %v2303_v1  ;;  %v2745_v2 = vpop.f32.mrb[3].mxu0 }
0x1394 PF: > { %p2750_p6 = scmp.eq.s32.totalorder %s2981_s26, 1  ;;  %s2902_s25 = smov [#allocation3]  }
0x1395   : > { %s2315_s6 = sshll.u32 %s2902_s25, 4  ;;  %s2316_s6 = int_to_ptr.vmem [resolvable:$true] %s2315_s6 }
0x1396   : > { %s2854_s27 = scalar_lea.vmem %s2316_s6, 256  ;;  %p2861_p10 = scmp.lt.s32.totalorder %s2316_s6, %s2316_s6 }
0x1397   : > { %p2855_p7 = scmp.ne.s32.totalorder %s2316_s6, %s2854_s27  ;;  %p2862_p11 = scmp.lt.s32.totalorder %s2854_s27, %s2854_s27 }
0x1399   : > { %p2856_p8 = pnand %p2855_p7, %p2750_p6  ;;  %p2863_p12 = por %p2862_p11, %p2861_p10 }
0x139b   : > { %p2857_p9 = pneg %p2856_p8 }
0x139d   : > { %p2864_p13 = pnand %p2863_p12, %p2857_p9 }
0x139f   : > { %2867 = shalt.err (!%p2864_p13)
}
0x13a0   : > { %s3370_s14 = sld [smem:[#allocation9_spill]] }
0x13a6   : > { %s2868_s17 = scalar_lea.hbm %s3370_s14, 256 }
0x13a7   : > { %p2869_p0 = scmp.ne.s32.totalorder %s3370_s14, %s2868_s17  ;;  %p2874_p3 = scmp.lt.u32.totalorder %s2868_s17, %s3370_s14 }
0x13a9   : > { %p2870_p1 = pnand %p2869_p0, %p2750_p6 }
0x13ab   : > { %p2871_p2 = pneg %p2870_p1 }
0x13ad   : > { %p2876_p4 = pnand %p2874_p3, %p2871_p2 }
0x13af   : > { %2879 = shalt.err (!%p2876_p4)
}
0x13b0   : > { %s2903_s18 = smov 128   ;;  %s2904_s21 = smov 8  }
0x13b1   : > { %2747 = dma.vmem_to_hbm [thread:$0]  (%p2750_p6), %s2316_s6, 256, %s3370_s14, [#allocation4], %s2903_s18, %s2903_s18, %s2904_s21  }
0x13b2   : > { %2885 = dma.done.wait (%p2750_p6), [#allocation4], 256  }
0x13b3   : > { %2887 = vsyncadd (%p2750_p6), [#allocation4], 4294967040 }
0x13b4 PF: > { %s3371_s24 = sld [smem:[#allocation6_spill]] }
0x13ba   : > { %s24_s25 = sadd.s32 1, %s3371_s24  }
0x13bb   : > { %p21_p5 = scmp.ge.s32.totalorder %s24_s25, 4  }
0x13bd   :  { %23 = sbr.rel (!%p21_p5) target bundleno = 5 (0x5), region = 125 }
0x13c4   :  { %2331 = vsyncpa [#allocation4], 1 }
0x13c5   :  { %2333 = vsyncpa [#allocation4 + $0x1], 1 }

</bundles_post_ra>
